<compile_context>
chip_gen: v7x
topology: tpu7x:2x2x1
jax: 0.10.0
libtpu: 0.0.40
codegen_flags: <defaults>
</compile_context>

<pallas_src>
import functools

import jax
import jax.numpy as jnp
from jax import lax
from jax.experimental import pallas as pl
from jax.experimental.pallas import tpu as pltpu

VMEM = pltpu.MemorySpace.VMEM
SMEM = pltpu.MemorySpace.SMEM
F32 = jnp.float32


def _eye(n, dtype):
    r = lax.broadcasted_iota(jnp.int32, (n, n), 0)
    c = lax.broadcasted_iota(jnp.int32, (n, n), 1)
    return (r == c).astype(dtype)


# ---------------------------------------------------------------------------
# relu(GATConv(x)) on a dense adjacency mask
# ---------------------------------------------------------------------------
def _gat(x, w, a_src, a_dst, b, mask):
    h = jnp.dot(x, w, preferred_element_type=F32)                       # MXU (N, F)
    # a_dst . h_i as a column: VPU multiply + XLU lane reduce (no tiny MXU dot
    # paying push/drain latency on the serial chain).
    s_dst = jnp.sum(h * a_dst, axis=1, keepdims=True)                   # (N, 1)
    # a_src . h_j must land along lanes (row form); one small dot_general gives
    # the (1, N) row directly without transposing h or the result.
    s_src = lax.dot_general(a_src, h, (((1,), (1,)), ((), ())),
                            preferred_element_type=F32)                 # (1, N)
    e = s_dst + s_src                                                   # (N, N)
    e = jnp.where(e >= 0.0, e, 0.2 * e)                                 # LeakyReLU(0.2)
    valid = mask > 0.0
    e = jnp.where(valid, e, -1e30)
    m = jnp.max(e, axis=1, keepdims=True)                               # self-loops => >=1 valid/row
    p = jnp.where(valid, jnp.exp(e - m), 0.0)
    alpha = p / jnp.sum(p, axis=1, keepdims=True)                       # softmax over incoming edges
    out = jnp.dot(alpha, h, preferred_element_type=F32) + b             # MXU (N, F)
    return jnp.maximum(out, 0.0)                                        # fused ReLU


# ---------------------------------------------------------------------------
# getGipKernel(h, 0, gamma, normalized=True) — exact unit diagonal
# ---------------------------------------------------------------------------
def _gip(h, gamma, eye):
    rmin = jnp.min(h, axis=1, keepdims=True)
    rmax = jnp.max(h, axis=1, keepdims=True)
    span = rmax - rmin
    span = jnp.where(span > 0.0, span, 1.0)      # guard constant rows (float64 original NaNs)
    y = (h - rmin) / span                        # row min-max normalization
    k0 = lax.dot_general(y, y, (((1,), (1,)), ((), ())),
                         preferred_element_type=F32)                    # y @ y.T  (M, M)
    # diag taken from the MXU result itself (exactly as the reference does) via
    # cheap XLU reduces -> dist_ii == 0 exactly, and no extra MXU ones-dots.
    k0d = k0 * eye
    d_col = jnp.sum(k0d, axis=1, keepdims=True)                         # (M, 1)
    d_row = jnp.sum(k0d, axis=0, keepdims=True)                         # (1, M)
    mean_diag = jnp.sum(d_col) / F32(h.shape[0])
    mean_diag = jnp.where(mean_diag != 0.0, mean_diag, 1.0)             # guard (float64 original NaNs)
    dist = d_col / mean_diag + d_row / mean_diag - 2.0 * (k0 / mean_diag)
    return jnp.exp(-gamma * dist)                # diagonal is exp(0) = 1 exactly


# ---------------------------------------------------------------------------
# normalized_kernel(sum_i att_i * K_i)
# ---------------------------------------------------------------------------
def _normalized_mix(k1, k2, k3, ksim, sim_diag_col, sim_diag_row, a0, a1, a2, a3):
    K = a0 * k1 + a1 * k2 + a2 * k3 + a3 * ksim
    K = jnp.abs(K)
    min_nz = jnp.min(jnp.where(K != 0.0, K, jnp.inf))                   # min nonzero entry
    min_nz = jnp.where(min_nz < 3.0e38, min_nz, 1.0)                    # guard all-zero K
    K = jnp.where(K == 0.0, min_nz, K)
    # diag(K) = a0*1 + a1*1 + a2*1 + a3*sim_ii (GIP kernels have exact unit
    # diagonal); bitwise-equal to the summed K diagonal, so no K reductions.
    asum = a0 + a1 + a2
    d_col = jnp.abs(asum + a3 * sim_diag_col)                           # (M, 1)
    d_row = jnp.abs(asum + a3 * sim_diag_row)                           # (1, M)
    d_col = jnp.where(d_col == 0.0, min_nz, d_col)
    d_row = jnp.where(d_row == 0.0, min_nz, d_row)
    return K / (jnp.sqrt(d_col) * jnp.sqrt(d_row))


# ---------------------------------------------------------------------------
# Whole Model.forward fused into one kernel body (grid = ())
# ---------------------------------------------------------------------------
def _mkgat_kernel(n, f_in, f1, f2, f3, m_size, d_size, g1, g2, g3,
                  node_ref, w_ref, vec_ref, sq_ref, att_ref, out_ref):
    # ---- unpack packed slabs (static, 8-aligned sublane ref slices) ----
    x    = node_ref[0:n, 0:f_in]
    mask = node_ref[n:2 * n, 0:n]

    w1 = w_ref[0:f_in, 0:f1]
    w2 = w_ref[f_in:f_in + f1, 0:f2]
    w3 = w_ref[f_in + f1:f_in + f1 + f2, 0:f3]

    vecs = vec_ref[...]                                  # (9, Fmax) one load, value slices
    asrc1, adst1, b1 = vecs[0:1, 0:f1], vecs[1:2, 0:f1], vecs[2:3, 0:f1]
    asrc2, adst2, b2 = vecs[3:4, 0:f2], vecs[4:5, 0:f2], vecs[5:6, 0:f2]
    asrc3, adst3, b3 = vecs[6:7, 0:f3], vecs[7:8, 0:f3], vecs[8:9, 0:f3]

    msim   = sq_ref[0:m_size, 0:m_size]
    dsim   = sq_ref[m_size:m_size + d_size, 0:d_size]
    alpha1 = sq_ref[m_size + d_size:2 * m_size + d_size, 0:d_size]
    a2t    = sq_ref[2 * m_size + d_size:3 * m_size + d_size, 0:d_size]   # alpha2.T

    # ---- constants + sim diagonals (depend only on inputs -> off the chain) ----
    eye_m = _eye(m_size, F32)
    eye_d = eye_m if d_size == m_size else _eye(d_size, F32)
    msim_d = msim * eye_m
    dsim_d = dsim * eye_d
    sdm_col = jnp.sum(msim_d, axis=1, keepdims=True)
    sdm_row = jnp.sum(msim_d, axis=0, keepdims=True)
    sdd_col = jnp.sum(dsim_d, axis=1, keepdims=True)
    sdd_row = jnp.sum(dsim_d, axis=0, keepdims=True)

    # ---- three stacked dense GAT layers (serial chain, VMEM/vreg resident) ----
    h1 = _gat(x,  w1, asrc1, adst1, b1, mask)
    h2 = _gat(h1, w2, asrc2, adst2, b2, mask)
    h3 = _gat(h2, w3, asrc3, adst3, b3, mask)

    # ---- six GIP kernels on 8-aligned sublane splits of the activations ----
    mk1, dk1 = _gip(h1[:m_size], g1, eye_m), _gip(h1[m_size:], g1, eye_d)
    mk2, dk2 = _gip(h2[:m_size], g2, eye_m), _gip(h2[m_size:], g2, eye_d)
    mk3, dk3 = _gip(h3[:m_size], g3, eye_m), _gip(h3[m_size:], g3, eye_d)

    am0, am1, am2, am3 = att_ref[0], att_ref[1], att_ref[2], att_ref[3]
    ad0, ad1, ad2, ad3 = att_ref[4], att_ref[5], att_ref[6], att_ref[7]

    s_m = _normalized_mix(mk1, mk2, mk3, msim, sdm_col, sdm_row, am0, am1, am2, am3)
    s_d = _normalized_mix(dk1, dk2, dk3, dsim, sdd_col, sdd_row, ad0, ad1, ad2, ad3)

    out1 = jnp.dot(s_m, alpha1, preferred_element_type=F32)             # (mira, disease)
    # (s_d @ alpha2).T == alpha2.T @ s_d.T : rhs-transposed contraction on the
    # pre-transposed alpha2 slab -> no XLU transpose of the result.
    out2_t = lax.dot_general(a2t, s_d, (((1,), (1,)), ((), ())),
                             preferred_element_type=F32)                # (mira, disease)
    out_ref[...] = 0.5 * (out1 + out2_t)


def _pad2d(a, rows, cols):
    a = a.astype(F32)
    r, c = a.shape
    if r == rows and c == cols:
        return a
    return jnp.pad(a, ((0, rows - r), (0, cols - c)))


@functools.partial(jax.jit, static_argnames=("mira_size", "gammas"))
def model_forward(params, feature, adj_mask, mira_size, gammas):
    """Full Model.forward as a single pallas_call (one dispatch, 5 input DMAs)."""
    n, f_in = feature.shape
    m_size = int(mira_size)
    d_size = n - m_size
    f1 = params["w1"].shape[1]
    f2 = params["w2"].shape[1]
    f3 = params["w3"].shape[1]
    fmax = max(f1, f2, f3)
    wnode = max(f_in, n)
    s = max(m_size, d_size)
    g1, g2, g3 = (float(g) for g in gammas)      # Python scalars -> literals, not captured consts

    # 8-aligned sublane offsets for the packed slabs / activation splits.
    for v in (n, f_in, f1, f2, m_size, d_size):
        assert v % 8 == 0, "node/feature dims must be multiples of 8"

    # ---- pack 20 tiny operands into 4 VMEM slabs + 1 SMEM vector ----
    node_slab = jnp.concatenate(
        [_pad2d(feature, n, wnode), _pad2d(adj_mask, n, wnode)], axis=0)
    w_slab = jnp.concatenate(
        [_pad2d(params["w1"], f_in, fmax),
         _pad2d(params["w2"], f1, fmax),
         _pad2d(params["w3"], f2, fmax)], axis=0)
    vec_slab = jnp.concatenate(
        [_pad2d(params["asrc1"], 1, fmax), _pad2d(params["adst1"], 1, fmax),
         _pad2d(params["b1"], 1, fmax),
         _pad2d(params["asrc2"], 1, fmax), _pad2d(params["adst2"], 1, fmax),
         _pad2d(params["b2"], 1, fmax),
         _pad2d(params["asrc3"], 1, fmax), _pad2d(params["adst3"], 1, fmax),
         _pad2d(params["b3"], 1, fmax)], axis=0)
    sq_slab = jnp.concatenate(
        [_pad2d(params["mirna_sim"], m_size, s),
         _pad2d(params["disease_sim"], d_size, s),
         _pad2d(params["alpha1"], m_size, s),
         _pad2d(params["alpha2"].T, m_size, s)], axis=0)
    att = jnp.concatenate(
        [params["att_m"].reshape(-1), params["att_d"].reshape(-1)]).astype(F32)

    kernel = functools.partial(_mkgat_kernel, n, f_in, f1, f2, f3,
                               m_size, d_size, g1, g2, g3)

    vmem = pl.BlockSpec(memory_space=VMEM)
    smem = pl.BlockSpec(memory_space=SMEM)

    return pl.pallas_call(
        kernel,
        out_shape=jax.ShapeDtypeStruct((m_size, d_size), jnp.float32),
        in_specs=[vmem, vmem, vmem, vmem, smem],
        out_specs=vmem,
        cost_estimate=pl.CostEstimate(
            flops=600_000, transcendentals=8_000, bytes_accessed=40_000),
    )(node_slab, w_slab, vec_slab, sq_slab, att)


if __name__ == "__main__":
    key = jax.random.PRNGKey(0)
    mira_size, disease_size = 16, 16
    n = mira_size + disease_size
    f_in, f1, f2, f3 = n, 32, 32, 16
    gammas = (0.5, 0.5, 0.5)

    keys = jax.random.split(key, 16)

    def glorot(k, shape):
        lim = (6.0 / (shape[0] + shape[-1])) ** 0.5
        return jax.random.uniform(k, shape, jnp.float32, -lim, lim)

    def sym_sim(k, m):
        a = jax.random.uniform(k, (m, m), jnp.float32)
        sym = 0.5 * (a + a.T)
        eye = jnp.eye(m, dtype=jnp.float32)
        return sym * (1.0 - eye) + eye

    params = dict(
        w1=glorot(keys[0], (f_in, f1)),
        asrc1=glorot(keys[1], (1, f1)),
        adst1=glorot(keys[2], (1, f1)),
        b1=jnp.zeros((1, f1), jnp.float32),
        w2=glorot(keys[3], (f1, f2)),
        asrc2=glorot(keys[4], (1, f2)),
        adst2=glorot(keys[5], (1, f2)),
        b2=jnp.zeros((1, f2), jnp.float32),
        w3=glorot(keys[6], (f2, f3)),
        asrc3=glorot(keys[7], (1, f3)),
        adst3=glorot(keys[8], (1, f3)),
        b3=jnp.zeros((1, f3), jnp.float32),
        att_m=jnp.ones((1, 4), jnp.float32),
        att_d=jnp.ones((1, 4), jnp.float32),
        alpha1=jax.random.normal(keys[9], (mira_size, disease_size), jnp.float32),
        alpha2=jax.random.normal(keys[10], (disease_size, mira_size), jnp.float32),
        mirna_sim=sym_sim(keys[11], mira_size),
        disease_sim=sym_sim(keys[12], disease_size),
    )

    # input['feature'] and input['Adj']['edge_index'] (as a dense mask, self-loops added)
    feature = jax.random.uniform(keys[13], (n, f_in), jnp.float32)
    rand_adj = (jax.random.uniform(keys[14], (n, n), jnp.float32) < 0.3).astype(jnp.float32)
    adj_mask = jnp.maximum(rand_adj, jnp.eye(n, dtype=jnp.float32))      # mask[i, j]: edge j -> i

    out = model_forward(params, feature, adj_mask, mira_size=mira_size, gammas=gammas)
    out = jax.block_until_ready(out)
    assert out.shape == (mira_size, disease_size)
    assert bool(jnp.all(jnp.isfinite(out)))
    print("KERNEL_OK")
</pallas_src>

<mosaic_0001>
module attributes {stable_mosaic.version = 11 : i64} {
  func.func @_mkgat_kernel(%arg0: memref<64x32xf32, #tpu.memory_space<vmem>>, %arg1: memref<96x32xf32, #tpu.memory_space<vmem>>, %arg2: memref<9x32xf32, #tpu.memory_space<vmem>>, %arg3: memref<64x16xf32, #tpu.memory_space<vmem>>, %arg4: memref<8xf32, #tpu.memory_space<smem>>, %arg5: memref<16x16xf32, #tpu.memory_space<vmem>>) attributes {dimension_semantics = [], scalar_prefetch = 0 : i64, scratch_operands = 0 : i64, tpu.core_type = #tpu.core_type<tc>} {
    %c0 = arith.constant 0 : index
    %c0_0 = arith.constant 0 : index
    %0 = vector.load %arg0[%c0, %c0_0] : memref<64x32xf32, #tpu.memory_space<vmem>>, vector<32x32xf32>
    %c32 = arith.constant 32 : index
    %c0_1 = arith.constant 0 : index
    %1 = vector.load %arg0[%c32, %c0_1] : memref<64x32xf32, #tpu.memory_space<vmem>>, vector<32x32xf32>
    %c0_2 = arith.constant 0 : index
    %c0_3 = arith.constant 0 : index
    %2 = vector.load %arg1[%c0_2, %c0_3] : memref<96x32xf32, #tpu.memory_space<vmem>>, vector<32x32xf32>
    %c32_4 = arith.constant 32 : index
    %c0_5 = arith.constant 0 : index
    %3 = vector.load %arg1[%c32_4, %c0_5] : memref<96x32xf32, #tpu.memory_space<vmem>>, vector<32x32xf32>
    %c64 = arith.constant 64 : index
    %c0_6 = arith.constant 0 : index
    %4 = vector.load %arg1[%c64, %c0_6] : memref<96x32xf32, #tpu.memory_space<vmem>>, vector<32x16xf32>
    %c0_7 = arith.constant 0 : index
    %c0_8 = arith.constant 0 : index
    %5 = vector.load %arg2[%c0_7, %c0_8] : memref<9x32xf32, #tpu.memory_space<vmem>>, vector<9x32xf32>
    %6 = vector.extract_strided_slice %5 {offsets = [0, 0], sizes = [1, 32], strides = [1, 1]} : vector<9x32xf32> to vector<1x32xf32>
    %7 = vector.extract_strided_slice %5 {offsets = [1, 0], sizes = [1, 32], strides = [1, 1]} : vector<9x32xf32> to vector<1x32xf32>
    %8 = vector.extract_strided_slice %5 {offsets = [2, 0], sizes = [1, 32], strides = [1, 1]} : vector<9x32xf32> to vector<1x32xf32>
    %9 = vector.extract_strided_slice %5 {offsets = [3, 0], sizes = [1, 32], strides = [1, 1]} : vector<9x32xf32> to vector<1x32xf32>
    %10 = vector.extract_strided_slice %5 {offsets = [4, 0], sizes = [1, 32], strides = [1, 1]} : vector<9x32xf32> to vector<1x32xf32>
    %11 = vector.extract_strided_slice %5 {offsets = [5, 0], sizes = [1, 32], strides = [1, 1]} : vector<9x32xf32> to vector<1x32xf32>
    %12 = vector.extract_strided_slice %5 {offsets = [6, 0], sizes = [1, 16], strides = [1, 1]} : vector<9x32xf32> to vector<1x16xf32>
    %13 = vector.extract_strided_slice %5 {offsets = [7, 0], sizes = [1, 16], strides = [1, 1]} : vector<9x32xf32> to vector<1x16xf32>
    %14 = vector.extract_strided_slice %5 {offsets = [8, 0], sizes = [1, 16], strides = [1, 1]} : vector<9x32xf32> to vector<1x16xf32>
    %c0_9 = arith.constant 0 : index
    %c0_10 = arith.constant 0 : index
    %15 = vector.load %arg3[%c0_9, %c0_10] : memref<64x16xf32, #tpu.memory_space<vmem>>, vector<16x16xf32>
    %c16 = arith.constant 16 : index
    %c0_11 = arith.constant 0 : index
    %16 = vector.load %arg3[%c16, %c0_11] : memref<64x16xf32, #tpu.memory_space<vmem>>, vector<16x16xf32>
    %c32_12 = arith.constant 32 : index
    %c0_13 = arith.constant 0 : index
    %17 = vector.load %arg3[%c32_12, %c0_13] : memref<64x16xf32, #tpu.memory_space<vmem>>, vector<16x16xf32>
    %c48 = arith.constant 48 : index
    %c0_14 = arith.constant 0 : index
    %18 = vector.load %arg3[%c48, %c0_14] : memref<64x16xf32, #tpu.memory_space<vmem>>, vector<16x16xf32>
    %19 = tpu.iota {dimensions = array<i32: 0>} : vector<16x16xi32>
    %20 = tpu.iota {dimensions = array<i32: 1>} : vector<16x16xi32>
    %21 = arith.cmpi eq, %19, %20 : vector<16x16xi32>
    %22 = arith.extui %21 : vector<16x16xi1> to vector<16x16xi32>
    %23 = arith.sitofp %22 : vector<16x16xi32> to vector<16x16xf32>
    %24 = arith.mulf %15, %23 : vector<16x16xf32>
    %25 = arith.mulf %16, %23 : vector<16x16xf32>
    %cst = arith.constant dense<0.000000e+00> : vector<16xf32>
    %26 = vector.multi_reduction <add>, %24, %cst [1] : vector<16x16xf32> to vector<16xf32>
    %27 = vector.shape_cast %26 : vector<16xf32> to vector<16x1xf32>
    %cst_15 = arith.constant dense<0.000000e+00> : vector<16xf32>
    %28 = vector.multi_reduction <add>, %24, %cst_15 [0] : vector<16x16xf32> to vector<16xf32>
    %29 = vector.shape_cast %28 : vector<16xf32> to vector<1x16xf32>
    %cst_16 = arith.constant dense<0.000000e+00> : vector<16xf32>
    %30 = vector.multi_reduction <add>, %25, %cst_16 [1] : vector<16x16xf32> to vector<16xf32>
    %31 = vector.shape_cast %30 : vector<16xf32> to vector<16x1xf32>
    %cst_17 = arith.constant dense<0.000000e+00> : vector<16xf32>
    %32 = vector.multi_reduction <add>, %25, %cst_17 [0] : vector<16x16xf32> to vector<16xf32>
    %33 = vector.shape_cast %32 : vector<16xf32> to vector<1x16xf32>
    %cst_18 = arith.constant dense<0.000000e+00> : vector<32x32xf32>
    %34 = tpu.matmul %0, %2, %cst_18 {dimension_numbers = #tpu.dot_dimension_numbers<[1], [0], [0], [1], [0, 0, 1, 1], [], []>} : vector<32x32xf32>, vector<32x32xf32>, vector<32x32xf32> -> vector<32x32xf32>
    %35 = vector.broadcast %7 : vector<1x32xf32> to vector<32x32xf32>
    %36 = arith.mulf %34, %35 : vector<32x32xf32>
    %cst_19 = arith.constant dense<0.000000e+00> : vector<32xf32>
    %37 = vector.multi_reduction <add>, %36, %cst_19 [1] : vector<32x32xf32> to vector<32xf32>
    %38 = vector.shape_cast %37 : vector<32xf32> to vector<32x1xf32>
    %cst_20 = arith.constant dense<0.000000e+00> : vector<1x32xf32>
    %39 = tpu.matmul %6, %34, %cst_20 {dimension_numbers = #tpu.dot_dimension_numbers<[1], [1], [0], [0], [0, 0, 1, 0], [], []>} : vector<1x32xf32>, vector<32x32xf32>, vector<1x32xf32> -> vector<1x32xf32>
    %40 = vector.broadcast %38 : vector<32x1xf32> to vector<32x32xf32>
    %41 = vector.broadcast %39 : vector<1x32xf32> to vector<32x32xf32>
    %42 = arith.addf %40, %41 : vector<32x32xf32>
    %cst_21 = arith.constant 0.000000e+00 : f32
    %43 = vector.broadcast %cst_21 : f32 to vector<32x32xf32>
    %44 = arith.cmpf oge, %42, %43 : vector<32x32xf32>
    %cst_22 = arith.constant 2.000000e-01 : f32
    %45 = vector.broadcast %cst_22 : f32 to vector<32x32xf32>
    %46 = arith.mulf %45, %42 : vector<32x32xf32>
    %47 = arith.select %44, %42, %46 : vector<32x32xi1>, vector<32x32xf32>
    %cst_23 = arith.constant 0.000000e+00 : f32
    %48 = vector.broadcast %cst_23 : f32 to vector<32x32xf32>
    %49 = arith.cmpf ogt, %1, %48 : vector<32x32xf32>
    %cst_24 = arith.constant -1.000000e+30 : f32
    %50 = vector.broadcast %cst_24 : f32 to vector<32x32xf32>
    %51 = arith.select %49, %47, %50 : vector<32x32xi1>, vector<32x32xf32>
    %cst_25 = arith.constant dense<0xFF800000> : vector<32xf32>
    %52 = vector.multi_reduction <maximumf>, %51, %cst_25 [1] : vector<32x32xf32> to vector<32xf32>
    %53 = vector.shape_cast %52 : vector<32xf32> to vector<32x1xf32>
    %54 = vector.broadcast %53 : vector<32x1xf32> to vector<32x32xf32>
    %55 = arith.subf %51, %54 : vector<32x32xf32>
    %56 = math.exp %55 : vector<32x32xf32>
    %cst_26 = arith.constant 0.000000e+00 : f32
    %57 = vector.broadcast %cst_26 : f32 to vector<32x32xf32>
    %58 = arith.select %49, %56, %57 : vector<32x32xi1>, vector<32x32xf32>
    %cst_27 = arith.constant dense<0.000000e+00> : vector<32xf32>
    %59 = vector.multi_reduction <add>, %58, %cst_27 [1] : vector<32x32xf32> to vector<32xf32>
    %60 = vector.shape_cast %59 : vector<32xf32> to vector<32x1xf32>
    %61 = vector.broadcast %60 : vector<32x1xf32> to vector<32x32xf32>
    %62 = arith.divf %58, %61 : vector<32x32xf32>
    %cst_28 = arith.constant dense<0.000000e+00> : vector<32x32xf32>
    %63 = tpu.matmul %62, %34, %cst_28 {dimension_numbers = #tpu.dot_dimension_numbers<[1], [0], [0], [1], [0, 0, 1, 1], [], []>} : vector<32x32xf32>, vector<32x32xf32>, vector<32x32xf32> -> vector<32x32xf32>
    %64 = vector.broadcast %8 : vector<1x32xf32> to vector<32x32xf32>
    %65 = arith.addf %63, %64 : vector<32x32xf32>
    %cst_29 = arith.constant 0.000000e+00 : f32
    %66 = vector.broadcast %cst_29 : f32 to vector<32x32xf32>
    %67 = arith.maximumf %65, %66 : vector<32x32xf32>
    %cst_30 = arith.constant dense<0.000000e+00> : vector<32x32xf32>
    %68 = tpu.matmul %67, %3, %cst_30 {dimension_numbers = #tpu.dot_dimension_numbers<[1], [0], [0], [1], [0, 0, 1, 1], [], []>} : vector<32x32xf32>, vector<32x32xf32>, vector<32x32xf32> -> vector<32x32xf32>
    %69 = vector.broadcast %10 : vector<1x32xf32> to vector<32x32xf32>
    %70 = arith.mulf %68, %69 : vector<32x32xf32>
    %cst_31 = arith.constant dense<0.000000e+00> : vector<32xf32>
    %71 = vector.multi_reduction <add>, %70, %cst_31 [1] : vector<32x32xf32> to vector<32xf32>
    %72 = vector.shape_cast %71 : vector<32xf32> to vector<32x1xf32>
    %cst_32 = arith.constant dense<0.000000e+00> : vector<1x32xf32>
    %73 = tpu.matmul %9, %68, %cst_32 {dimension_numbers = #tpu.dot_dimension_numbers<[1], [1], [0], [0], [0, 0, 1, 0], [], []>} : vector<1x32xf32>, vector<32x32xf32>, vector<1x32xf32> -> vector<1x32xf32>
    %74 = vector.broadcast %72 : vector<32x1xf32> to vector<32x32xf32>
    %75 = vector.broadcast %73 : vector<1x32xf32> to vector<32x32xf32>
    %76 = arith.addf %74, %75 : vector<32x32xf32>
    %cst_33 = arith.constant 0.000000e+00 : f32
    %77 = vector.broadcast %cst_33 : f32 to vector<32x32xf32>
    %78 = arith.cmpf oge, %76, %77 : vector<32x32xf32>
    %cst_34 = arith.constant 2.000000e-01 : f32
    %79 = vector.broadcast %cst_34 : f32 to vector<32x32xf32>
    %80 = arith.mulf %79, %76 : vector<32x32xf32>
    %81 = arith.select %78, %76, %80 : vector<32x32xi1>, vector<32x32xf32>
    %cst_35 = arith.constant 0.000000e+00 : f32
    %82 = vector.broadcast %cst_35 : f32 to vector<32x32xf32>
    %83 = arith.cmpf ogt, %1, %82 : vector<32x32xf32>
    %cst_36 = arith.constant -1.000000e+30 : f32
    %84 = vector.broadcast %cst_36 : f32 to vector<32x32xf32>
    %85 = arith.select %83, %81, %84 : vector<32x32xi1>, vector<32x32xf32>
    %cst_37 = arith.constant dense<0xFF800000> : vector<32xf32>
    %86 = vector.multi_reduction <maximumf>, %85, %cst_37 [1] : vector<32x32xf32> to vector<32xf32>
    %87 = vector.shape_cast %86 : vector<32xf32> to vector<32x1xf32>
    %88 = vector.broadcast %87 : vector<32x1xf32> to vector<32x32xf32>
    %89 = arith.subf %85, %88 : vector<32x32xf32>
    %90 = math.exp %89 : vector<32x32xf32>
    %cst_38 = arith.constant 0.000000e+00 : f32
    %91 = vector.broadcast %cst_38 : f32 to vector<32x32xf32>
    %92 = arith.select %83, %90, %91 : vector<32x32xi1>, vector<32x32xf32>
    %cst_39 = arith.constant dense<0.000000e+00> : vector<32xf32>
    %93 = vector.multi_reduction <add>, %92, %cst_39 [1] : vector<32x32xf32> to vector<32xf32>
    %94 = vector.shape_cast %93 : vector<32xf32> to vector<32x1xf32>
    %95 = vector.broadcast %94 : vector<32x1xf32> to vector<32x32xf32>
    %96 = arith.divf %92, %95 : vector<32x32xf32>
    %cst_40 = arith.constant dense<0.000000e+00> : vector<32x32xf32>
    %97 = tpu.matmul %96, %68, %cst_40 {dimension_numbers = #tpu.dot_dimension_numbers<[1], [0], [0], [1], [0, 0, 1, 1], [], []>} : vector<32x32xf32>, vector<32x32xf32>, vector<32x32xf32> -> vector<32x32xf32>
    %98 = vector.broadcast %11 : vector<1x32xf32> to vector<32x32xf32>
    %99 = arith.addf %97, %98 : vector<32x32xf32>
    %cst_41 = arith.constant 0.000000e+00 : f32
    %100 = vector.broadcast %cst_41 : f32 to vector<32x32xf32>
    %101 = arith.maximumf %99, %100 : vector<32x32xf32>
    %cst_42 = arith.constant dense<0.000000e+00> : vector<32x16xf32>
    %102 = tpu.matmul %101, %4, %cst_42 {dimension_numbers = #tpu.dot_dimension_numbers<[1], [0], [0], [1], [0, 0, 1, 1], [], []>} : vector<32x32xf32>, vector<32x16xf32>, vector<32x16xf32> -> vector<32x16xf32>
    %103 = vector.broadcast %13 : vector<1x16xf32> to vector<32x16xf32>
    %104 = arith.mulf %102, %103 : vector<32x16xf32>
    %cst_43 = arith.constant dense<0.000000e+00> : vector<32xf32>
    %105 = vector.multi_reduction <add>, %104, %cst_43 [1] : vector<32x16xf32> to vector<32xf32>
    %106 = vector.shape_cast %105 : vector<32xf32> to vector<32x1xf32>
    %cst_44 = arith.constant dense<0.000000e+00> : vector<1x32xf32>
    %107 = tpu.matmul %12, %102, %cst_44 {dimension_numbers = #tpu.dot_dimension_numbers<[1], [1], [0], [0], [0, 0, 1, 0], [], []>} : vector<1x16xf32>, vector<32x16xf32>, vector<1x32xf32> -> vector<1x32xf32>
    %108 = vector.broadcast %106 : vector<32x1xf32> to vector<32x32xf32>
    %109 = vector.broadcast %107 : vector<1x32xf32> to vector<32x32xf32>
    %110 = arith.addf %108, %109 : vector<32x32xf32>
    %cst_45 = arith.constant 0.000000e+00 : f32
    %111 = vector.broadcast %cst_45 : f32 to vector<32x32xf32>
    %112 = arith.cmpf oge, %110, %111 : vector<32x32xf32>
    %cst_46 = arith.constant 2.000000e-01 : f32
    %113 = vector.broadcast %cst_46 : f32 to vector<32x32xf32>
    %114 = arith.mulf %113, %110 : vector<32x32xf32>
    %115 = arith.select %112, %110, %114 : vector<32x32xi1>, vector<32x32xf32>
    %cst_47 = arith.constant 0.000000e+00 : f32
    %116 = vector.broadcast %cst_47 : f32 to vector<32x32xf32>
    %117 = arith.cmpf ogt, %1, %116 : vector<32x32xf32>
    %cst_48 = arith.constant -1.000000e+30 : f32
    %118 = vector.broadcast %cst_48 : f32 to vector<32x32xf32>
    %119 = arith.select %117, %115, %118 : vector<32x32xi1>, vector<32x32xf32>
    %cst_49 = arith.constant dense<0xFF800000> : vector<32xf32>
    %120 = vector.multi_reduction <maximumf>, %119, %cst_49 [1] : vector<32x32xf32> to vector<32xf32>
    %121 = vector.shape_cast %120 : vector<32xf32> to vector<32x1xf32>
    %122 = vector.broadcast %121 : vector<32x1xf32> to vector<32x32xf32>
    %123 = arith.subf %119, %122 : vector<32x32xf32>
    %124 = math.exp %123 : vector<32x32xf32>
    %cst_50 = arith.constant 0.000000e+00 : f32
    %125 = vector.broadcast %cst_50 : f32 to vector<32x32xf32>
    %126 = arith.select %117, %124, %125 : vector<32x32xi1>, vector<32x32xf32>
    %cst_51 = arith.constant dense<0.000000e+00> : vector<32xf32>
    %127 = vector.multi_reduction <add>, %126, %cst_51 [1] : vector<32x32xf32> to vector<32xf32>
    %128 = vector.shape_cast %127 : vector<32xf32> to vector<32x1xf32>
    %129 = vector.broadcast %128 : vector<32x1xf32> to vector<32x32xf32>
    %130 = arith.divf %126, %129 : vector<32x32xf32>
    %cst_52 = arith.constant dense<0.000000e+00> : vector<32x16xf32>
    %131 = tpu.matmul %130, %102, %cst_52 {dimension_numbers = #tpu.dot_dimension_numbers<[1], [0], [0], [1], [0, 0, 1, 1], [], []>} : vector<32x32xf32>, vector<32x16xf32>, vector<32x16xf32> -> vector<32x16xf32>
    %132 = vector.broadcast %14 : vector<1x16xf32> to vector<32x16xf32>
    %133 = arith.addf %131, %132 : vector<32x16xf32>
    %cst_53 = arith.constant 0.000000e+00 : f32
    %134 = vector.broadcast %cst_53 : f32 to vector<32x16xf32>
    %135 = arith.maximumf %133, %134 : vector<32x16xf32>
    %136 = vector.extract_strided_slice %67 {offsets = [0, 0], sizes = [16, 32], strides = [1, 1]} : vector<32x32xf32> to vector<16x32xf32>
    %cst_54 = arith.constant dense<0x7F800000> : vector<16xf32>
    %137 = vector.multi_reduction <minimumf>, %136, %cst_54 [1] : vector<16x32xf32> to vector<16xf32>
    %138 = vector.shape_cast %137 : vector<16xf32> to vector<16x1xf32>
    %cst_55 = arith.constant dense<0xFF800000> : vector<16xf32>
    %139 = vector.multi_reduction <maximumf>, %136, %cst_55 [1] : vector<16x32xf32> to vector<16xf32>
    %140 = vector.shape_cast %139 : vector<16xf32> to vector<16x1xf32>
    %141 = arith.subf %140, %138 : vector<16x1xf32>
    %cst_56 = arith.constant 0.000000e+00 : f32
    %142 = vector.broadcast %cst_56 : f32 to vector<16x1xf32>
    %143 = arith.cmpf ogt, %141, %142 : vector<16x1xf32>
    %cst_57 = arith.constant 1.000000e+00 : f32
    %144 = vector.broadcast %cst_57 : f32 to vector<16x1xf32>
    %145 = arith.select %143, %141, %144 : vector<16x1xi1>, vector<16x1xf32>
    %146 = vector.broadcast %138 : vector<16x1xf32> to vector<16x32xf32>
    %147 = arith.subf %136, %146 : vector<16x32xf32>
    %148 = vector.broadcast %145 : vector<16x1xf32> to vector<16x32xf32>
    %149 = arith.divf %147, %148 : vector<16x32xf32>
    %cst_58 = arith.constant dense<0.000000e+00> : vector<16x16xf32>
    %150 = tpu.matmul %149, %149, %cst_58 {dimension_numbers = #tpu.dot_dimension_numbers<[1], [1], [0], [0], [0, 0, 1, 0], [], []>} : vector<16x32xf32>, vector<16x32xf32>, vector<16x16xf32> -> vector<16x16xf32>
    %151 = arith.mulf %150, %23 : vector<16x16xf32>
    %cst_59 = arith.constant dense<0.000000e+00> : vector<16xf32>
    %152 = vector.multi_reduction <add>, %151, %cst_59 [1] : vector<16x16xf32> to vector<16xf32>
    %153 = vector.shape_cast %152 : vector<16xf32> to vector<16x1xf32>
    %cst_60 = arith.constant dense<0.000000e+00> : vector<16xf32>
    %154 = vector.multi_reduction <add>, %151, %cst_60 [0] : vector<16x16xf32> to vector<16xf32>
    %155 = vector.shape_cast %154 : vector<16xf32> to vector<1x16xf32>
    %156 = vector.shape_cast %153 : vector<16x1xf32> to vector<1x16x1xf32>
    %cst_61 = arith.constant dense<0.000000e+00> : vector<1xf32>
    %157 = vector.multi_reduction <add>, %156, %cst_61 [1, 2] : vector<1x16x1xf32> to vector<1xf32>
    %158 = vector.shape_cast %157 : vector<1xf32> to vector<1x1x1xf32>
    %159 = vector.extract %158[0, 0, 0] : f32 from vector<1x1x1xf32>
    %cst_62 = arith.constant 1.600000e+01 : f32
    %160 = arith.divf %159, %cst_62 : f32
    %cst_63 = arith.constant 0.000000e+00 : f32
    %161 = arith.cmpf one, %160, %cst_63 : f32
    %cst_64 = arith.constant 1.000000e+00 : f32
    %162 = arith.select %161, %160, %cst_64 : f32
    %163 = vector.broadcast %162 : f32 to vector<16x1xf32>
    %164 = arith.divf %153, %163 : vector<16x1xf32>
    %165 = vector.broadcast %162 : f32 to vector<1x16xf32>
    %166 = arith.divf %155, %165 : vector<1x16xf32>
    %167 = vector.broadcast %164 : vector<16x1xf32> to vector<16x16xf32>
    %168 = vector.broadcast %166 : vector<1x16xf32> to vector<16x16xf32>
    %169 = arith.addf %167, %168 : vector<16x16xf32>
    %170 = vector.broadcast %162 : f32 to vector<16x16xf32>
    %171 = arith.divf %150, %170 : vector<16x16xf32>
    %cst_65 = arith.constant 2.000000e+00 : f32
    %172 = vector.broadcast %cst_65 : f32 to vector<16x16xf32>
    %173 = arith.mulf %172, %171 : vector<16x16xf32>
    %174 = arith.subf %169, %173 : vector<16x16xf32>
    %cst_66 = arith.constant -5.000000e-01 : f32
    %175 = vector.broadcast %cst_66 : f32 to vector<16x16xf32>
    %176 = arith.mulf %175, %174 : vector<16x16xf32>
    %177 = math.exp %176 : vector<16x16xf32>
    %178 = vector.extract_strided_slice %67 {offsets = [16, 0], sizes = [16, 32], strides = [1, 1]} : vector<32x32xf32> to vector<16x32xf32>
    %cst_67 = arith.constant dense<0x7F800000> : vector<16xf32>
    %179 = vector.multi_reduction <minimumf>, %178, %cst_67 [1] : vector<16x32xf32> to vector<16xf32>
    %180 = vector.shape_cast %179 : vector<16xf32> to vector<16x1xf32>
    %cst_68 = arith.constant dense<0xFF800000> : vector<16xf32>
    %181 = vector.multi_reduction <maximumf>, %178, %cst_68 [1] : vector<16x32xf32> to vector<16xf32>
    %182 = vector.shape_cast %181 : vector<16xf32> to vector<16x1xf32>
    %183 = arith.subf %182, %180 : vector<16x1xf32>
    %cst_69 = arith.constant 0.000000e+00 : f32
    %184 = vector.broadcast %cst_69 : f32 to vector<16x1xf32>
    %185 = arith.cmpf ogt, %183, %184 : vector<16x1xf32>
    %cst_70 = arith.constant 1.000000e+00 : f32
    %186 = vector.broadcast %cst_70 : f32 to vector<16x1xf32>
    %187 = arith.select %185, %183, %186 : vector<16x1xi1>, vector<16x1xf32>
    %188 = vector.broadcast %180 : vector<16x1xf32> to vector<16x32xf32>
    %189 = arith.subf %178, %188 : vector<16x32xf32>
    %190 = vector.broadcast %187 : vector<16x1xf32> to vector<16x32xf32>
    %191 = arith.divf %189, %190 : vector<16x32xf32>
    %cst_71 = arith.constant dense<0.000000e+00> : vector<16x16xf32>
    %192 = tpu.matmul %191, %191, %cst_71 {dimension_numbers = #tpu.dot_dimension_numbers<[1], [1], [0], [0], [0, 0, 1, 0], [], []>} : vector<16x32xf32>, vector<16x32xf32>, vector<16x16xf32> -> vector<16x16xf32>
    %193 = arith.mulf %192, %23 : vector<16x16xf32>
    %cst_72 = arith.constant dense<0.000000e+00> : vector<16xf32>
    %194 = vector.multi_reduction <add>, %193, %cst_72 [1] : vector<16x16xf32> to vector<16xf32>
    %195 = vector.shape_cast %194 : vector<16xf32> to vector<16x1xf32>
    %cst_73 = arith.constant dense<0.000000e+00> : vector<16xf32>
    %196 = vector.multi_reduction <add>, %193, %cst_73 [0] : vector<16x16xf32> to vector<16xf32>
    %197 = vector.shape_cast %196 : vector<16xf32> to vector<1x16xf32>
    %198 = vector.shape_cast %195 : vector<16x1xf32> to vector<1x16x1xf32>
    %cst_74 = arith.constant dense<0.000000e+00> : vector<1xf32>
    %199 = vector.multi_reduction <add>, %198, %cst_74 [1, 2] : vector<1x16x1xf32> to vector<1xf32>
    %200 = vector.shape_cast %199 : vector<1xf32> to vector<1x1x1xf32>
    %201 = vector.extract %200[0, 0, 0] : f32 from vector<1x1x1xf32>
    %cst_75 = arith.constant 1.600000e+01 : f32
    %202 = arith.divf %201, %cst_75 : f32
    %cst_76 = arith.constant 0.000000e+00 : f32
    %203 = arith.cmpf one, %202, %cst_76 : f32
    %cst_77 = arith.constant 1.000000e+00 : f32
    %204 = arith.select %203, %202, %cst_77 : f32
    %205 = vector.broadcast %204 : f32 to vector<16x1xf32>
    %206 = arith.divf %195, %205 : vector<16x1xf32>
    %207 = vector.broadcast %204 : f32 to vector<1x16xf32>
    %208 = arith.divf %197, %207 : vector<1x16xf32>
    %209 = vector.broadcast %206 : vector<16x1xf32> to vector<16x16xf32>
    %210 = vector.broadcast %208 : vector<1x16xf32> to vector<16x16xf32>
    %211 = arith.addf %209, %210 : vector<16x16xf32>
    %212 = vector.broadcast %204 : f32 to vector<16x16xf32>
    %213 = arith.divf %192, %212 : vector<16x16xf32>
    %cst_78 = arith.constant 2.000000e+00 : f32
    %214 = vector.broadcast %cst_78 : f32 to vector<16x16xf32>
    %215 = arith.mulf %214, %213 : vector<16x16xf32>
    %216 = arith.subf %211, %215 : vector<16x16xf32>
    %cst_79 = arith.constant -5.000000e-01 : f32
    %217 = vector.broadcast %cst_79 : f32 to vector<16x16xf32>
    %218 = arith.mulf %217, %216 : vector<16x16xf32>
    %219 = math.exp %218 : vector<16x16xf32>
    %220 = vector.extract_strided_slice %101 {offsets = [0, 0], sizes = [16, 32], strides = [1, 1]} : vector<32x32xf32> to vector<16x32xf32>
    %cst_80 = arith.constant dense<0x7F800000> : vector<16xf32>
    %221 = vector.multi_reduction <minimumf>, %220, %cst_80 [1] : vector<16x32xf32> to vector<16xf32>
    %222 = vector.shape_cast %221 : vector<16xf32> to vector<16x1xf32>
    %cst_81 = arith.constant dense<0xFF800000> : vector<16xf32>
    %223 = vector.multi_reduction <maximumf>, %220, %cst_81 [1] : vector<16x32xf32> to vector<16xf32>
    %224 = vector.shape_cast %223 : vector<16xf32> to vector<16x1xf32>
    %225 = arith.subf %224, %222 : vector<16x1xf32>
    %cst_82 = arith.constant 0.000000e+00 : f32
    %226 = vector.broadcast %cst_82 : f32 to vector<16x1xf32>
    %227 = arith.cmpf ogt, %225, %226 : vector<16x1xf32>
    %cst_83 = arith.constant 1.000000e+00 : f32
    %228 = vector.broadcast %cst_83 : f32 to vector<16x1xf32>
    %229 = arith.select %227, %225, %228 : vector<16x1xi1>, vector<16x1xf32>
    %230 = vector.broadcast %222 : vector<16x1xf32> to vector<16x32xf32>
    %231 = arith.subf %220, %230 : vector<16x32xf32>
    %232 = vector.broadcast %229 : vector<16x1xf32> to vector<16x32xf32>
    %233 = arith.divf %231, %232 : vector<16x32xf32>
    %cst_84 = arith.constant dense<0.000000e+00> : vector<16x16xf32>
    %234 = tpu.matmul %233, %233, %cst_84 {dimension_numbers = #tpu.dot_dimension_numbers<[1], [1], [0], [0], [0, 0, 1, 0], [], []>} : vector<16x32xf32>, vector<16x32xf32>, vector<16x16xf32> -> vector<16x16xf32>
    %235 = arith.mulf %234, %23 : vector<16x16xf32>
    %cst_85 = arith.constant dense<0.000000e+00> : vector<16xf32>
    %236 = vector.multi_reduction <add>, %235, %cst_85 [1] : vector<16x16xf32> to vector<16xf32>
    %237 = vector.shape_cast %236 : vector<16xf32> to vector<16x1xf32>
    %cst_86 = arith.constant dense<0.000000e+00> : vector<16xf32>
    %238 = vector.multi_reduction <add>, %235, %cst_86 [0] : vector<16x16xf32> to vector<16xf32>
    %239 = vector.shape_cast %238 : vector<16xf32> to vector<1x16xf32>
    %240 = vector.shape_cast %237 : vector<16x1xf32> to vector<1x16x1xf32>
    %cst_87 = arith.constant dense<0.000000e+00> : vector<1xf32>
    %241 = vector.multi_reduction <add>, %240, %cst_87 [1, 2] : vector<1x16x1xf32> to vector<1xf32>
    %242 = vector.shape_cast %241 : vector<1xf32> to vector<1x1x1xf32>
    %243 = vector.extract %242[0, 0, 0] : f32 from vector<1x1x1xf32>
    %cst_88 = arith.constant 1.600000e+01 : f32
    %244 = arith.divf %243, %cst_88 : f32
    %cst_89 = arith.constant 0.000000e+00 : f32
    %245 = arith.cmpf one, %244, %cst_89 : f32
    %cst_90 = arith.constant 1.000000e+00 : f32
    %246 = arith.select %245, %244, %cst_90 : f32
    %247 = vector.broadcast %246 : f32 to vector<16x1xf32>
    %248 = arith.divf %237, %247 : vector<16x1xf32>
    %249 = vector.broadcast %246 : f32 to vector<1x16xf32>
    %250 = arith.divf %239, %249 : vector<1x16xf32>
    %251 = vector.broadcast %248 : vector<16x1xf32> to vector<16x16xf32>
    %252 = vector.broadcast %250 : vector<1x16xf32> to vector<16x16xf32>
    %253 = arith.addf %251, %252 : vector<16x16xf32>
    %254 = vector.broadcast %246 : f32 to vector<16x16xf32>
    %255 = arith.divf %234, %254 : vector<16x16xf32>
    %cst_91 = arith.constant 2.000000e+00 : f32
    %256 = vector.broadcast %cst_91 : f32 to vector<16x16xf32>
    %257 = arith.mulf %256, %255 : vector<16x16xf32>
    %258 = arith.subf %253, %257 : vector<16x16xf32>
    %cst_92 = arith.constant -5.000000e-01 : f32
    %259 = vector.broadcast %cst_92 : f32 to vector<16x16xf32>
    %260 = arith.mulf %259, %258 : vector<16x16xf32>
    %261 = math.exp %260 : vector<16x16xf32>
    %262 = vector.extract_strided_slice %101 {offsets = [16, 0], sizes = [16, 32], strides = [1, 1]} : vector<32x32xf32> to vector<16x32xf32>
    %cst_93 = arith.constant dense<0x7F800000> : vector<16xf32>
    %263 = vector.multi_reduction <minimumf>, %262, %cst_93 [1] : vector<16x32xf32> to vector<16xf32>
    %264 = vector.shape_cast %263 : vector<16xf32> to vector<16x1xf32>
    %cst_94 = arith.constant dense<0xFF800000> : vector<16xf32>
    %265 = vector.multi_reduction <maximumf>, %262, %cst_94 [1] : vector<16x32xf32> to vector<16xf32>
    %266 = vector.shape_cast %265 : vector<16xf32> to vector<16x1xf32>
    %267 = arith.subf %266, %264 : vector<16x1xf32>
    %cst_95 = arith.constant 0.000000e+00 : f32
    %268 = vector.broadcast %cst_95 : f32 to vector<16x1xf32>
    %269 = arith.cmpf ogt, %267, %268 : vector<16x1xf32>
    %cst_96 = arith.constant 1.000000e+00 : f32
    %270 = vector.broadcast %cst_96 : f32 to vector<16x1xf32>
    %271 = arith.select %269, %267, %270 : vector<16x1xi1>, vector<16x1xf32>
    %272 = vector.broadcast %264 : vector<16x1xf32> to vector<16x32xf32>
    %273 = arith.subf %262, %272 : vector<16x32xf32>
    %274 = vector.broadcast %271 : vector<16x1xf32> to vector<16x32xf32>
    %275 = arith.divf %273, %274 : vector<16x32xf32>
    %cst_97 = arith.constant dense<0.000000e+00> : vector<16x16xf32>
    %276 = tpu.matmul %275, %275, %cst_97 {dimension_numbers = #tpu.dot_dimension_numbers<[1], [1], [0], [0], [0, 0, 1, 0], [], []>} : vector<16x32xf32>, vector<16x32xf32>, vector<16x16xf32> -> vector<16x16xf32>
    %277 = arith.mulf %276, %23 : vector<16x16xf32>
    %cst_98 = arith.constant dense<0.000000e+00> : vector<16xf32>
    %278 = vector.multi_reduction <add>, %277, %cst_98 [1] : vector<16x16xf32> to vector<16xf32>
    %279 = vector.shape_cast %278 : vector<16xf32> to vector<16x1xf32>
    %cst_99 = arith.constant dense<0.000000e+00> : vector<16xf32>
    %280 = vector.multi_reduction <add>, %277, %cst_99 [0] : vector<16x16xf32> to vector<16xf32>
    %281 = vector.shape_cast %280 : vector<16xf32> to vector<1x16xf32>
    %282 = vector.shape_cast %279 : vector<16x1xf32> to vector<1x16x1xf32>
    %cst_100 = arith.constant dense<0.000000e+00> : vector<1xf32>
    %283 = vector.multi_reduction <add>, %282, %cst_100 [1, 2] : vector<1x16x1xf32> to vector<1xf32>
    %284 = vector.shape_cast %283 : vector<1xf32> to vector<1x1x1xf32>
    %285 = vector.extract %284[0, 0, 0] : f32 from vector<1x1x1xf32>
    %cst_101 = arith.constant 1.600000e+01 : f32
    %286 = arith.divf %285, %cst_101 : f32
    %cst_102 = arith.constant 0.000000e+00 : f32
    %287 = arith.cmpf one, %286, %cst_102 : f32
    %cst_103 = arith.constant 1.000000e+00 : f32
    %288 = arith.select %287, %286, %cst_103 : f32
    %289 = vector.broadcast %288 : f32 to vector<16x1xf32>
    %290 = arith.divf %279, %289 : vector<16x1xf32>
    %291 = vector.broadcast %288 : f32 to vector<1x16xf32>
    %292 = arith.divf %281, %291 : vector<1x16xf32>
    %293 = vector.broadcast %290 : vector<16x1xf32> to vector<16x16xf32>
    %294 = vector.broadcast %292 : vector<1x16xf32> to vector<16x16xf32>
    %295 = arith.addf %293, %294 : vector<16x16xf32>
    %296 = vector.broadcast %288 : f32 to vector<16x16xf32>
    %297 = arith.divf %276, %296 : vector<16x16xf32>
    %cst_104 = arith.constant 2.000000e+00 : f32
    %298 = vector.broadcast %cst_104 : f32 to vector<16x16xf32>
    %299 = arith.mulf %298, %297 : vector<16x16xf32>
    %300 = arith.subf %295, %299 : vector<16x16xf32>
    %cst_105 = arith.constant -5.000000e-01 : f32
    %301 = vector.broadcast %cst_105 : f32 to vector<16x16xf32>
    %302 = arith.mulf %301, %300 : vector<16x16xf32>
    %303 = math.exp %302 : vector<16x16xf32>
    %304 = vector.extract_strided_slice %135 {offsets = [0, 0], sizes = [16, 16], strides = [1, 1]} : vector<32x16xf32> to vector<16x16xf32>
    %cst_106 = arith.constant dense<0x7F800000> : vector<16xf32>
    %305 = vector.multi_reduction <minimumf>, %304, %cst_106 [1] : vector<16x16xf32> to vector<16xf32>
    %306 = vector.shape_cast %305 : vector<16xf32> to vector<16x1xf32>
    %cst_107 = arith.constant dense<0xFF800000> : vector<16xf32>
    %307 = vector.multi_reduction <maximumf>, %304, %cst_107 [1] : vector<16x16xf32> to vector<16xf32>
    %308 = vector.shape_cast %307 : vector<16xf32> to vector<16x1xf32>
    %309 = arith.subf %308, %306 : vector<16x1xf32>
    %cst_108 = arith.constant 0.000000e+00 : f32
    %310 = vector.broadcast %cst_108 : f32 to vector<16x1xf32>
    %311 = arith.cmpf ogt, %309, %310 : vector<16x1xf32>
    %cst_109 = arith.constant 1.000000e+00 : f32
    %312 = vector.broadcast %cst_109 : f32 to vector<16x1xf32>
    %313 = arith.select %311, %309, %312 : vector<16x1xi1>, vector<16x1xf32>
    %314 = vector.broadcast %306 : vector<16x1xf32> to vector<16x16xf32>
    %315 = arith.subf %304, %314 : vector<16x16xf32>
    %316 = vector.broadcast %313 : vector<16x1xf32> to vector<16x16xf32>
    %317 = arith.divf %315, %316 : vector<16x16xf32>
    %cst_110 = arith.constant dense<0.000000e+00> : vector<16x16xf32>
    %318 = tpu.matmul %317, %317, %cst_110 {dimension_numbers = #tpu.dot_dimension_numbers<[1], [1], [0], [0], [0, 0, 1, 0], [], []>} : vector<16x16xf32>, vector<16x16xf32>, vector<16x16xf32> -> vector<16x16xf32>
    %319 = arith.mulf %318, %23 : vector<16x16xf32>
    %cst_111 = arith.constant dense<0.000000e+00> : vector<16xf32>
    %320 = vector.multi_reduction <add>, %319, %cst_111 [1] : vector<16x16xf32> to vector<16xf32>
    %321 = vector.shape_cast %320 : vector<16xf32> to vector<16x1xf32>
    %cst_112 = arith.constant dense<0.000000e+00> : vector<16xf32>
    %322 = vector.multi_reduction <add>, %319, %cst_112 [0] : vector<16x16xf32> to vector<16xf32>
    %323 = vector.shape_cast %322 : vector<16xf32> to vector<1x16xf32>
    %324 = vector.shape_cast %321 : vector<16x1xf32> to vector<1x16x1xf32>
    %cst_113 = arith.constant dense<0.000000e+00> : vector<1xf32>
    %325 = vector.multi_reduction <add>, %324, %cst_113 [1, 2] : vector<1x16x1xf32> to vector<1xf32>
    %326 = vector.shape_cast %325 : vector<1xf32> to vector<1x1x1xf32>
    %327 = vector.extract %326[0, 0, 0] : f32 from vector<1x1x1xf32>
    %cst_114 = arith.constant 1.600000e+01 : f32
    %328 = arith.divf %327, %cst_114 : f32
    %cst_115 = arith.constant 0.000000e+00 : f32
    %329 = arith.cmpf one, %328, %cst_115 : f32
    %cst_116 = arith.constant 1.000000e+00 : f32
    %330 = arith.select %329, %328, %cst_116 : f32
    %331 = vector.broadcast %330 : f32 to vector<16x1xf32>
    %332 = arith.divf %321, %331 : vector<16x1xf32>
    %333 = vector.broadcast %330 : f32 to vector<1x16xf32>
    %334 = arith.divf %323, %333 : vector<1x16xf32>
    %335 = vector.broadcast %332 : vector<16x1xf32> to vector<16x16xf32>
    %336 = vector.broadcast %334 : vector<1x16xf32> to vector<16x16xf32>
    %337 = arith.addf %335, %336 : vector<16x16xf32>
    %338 = vector.broadcast %330 : f32 to vector<16x16xf32>
    %339 = arith.divf %318, %338 : vector<16x16xf32>
    %cst_117 = arith.constant 2.000000e+00 : f32
    %340 = vector.broadcast %cst_117 : f32 to vector<16x16xf32>
    %341 = arith.mulf %340, %339 : vector<16x16xf32>
    %342 = arith.subf %337, %341 : vector<16x16xf32>
    %cst_118 = arith.constant -5.000000e-01 : f32
    %343 = vector.broadcast %cst_118 : f32 to vector<16x16xf32>
    %344 = arith.mulf %343, %342 : vector<16x16xf32>
    %345 = math.exp %344 : vector<16x16xf32>
    %346 = vector.extract_strided_slice %135 {offsets = [16, 0], sizes = [16, 16], strides = [1, 1]} : vector<32x16xf32> to vector<16x16xf32>
    %cst_119 = arith.constant dense<0x7F800000> : vector<16xf32>
    %347 = vector.multi_reduction <minimumf>, %346, %cst_119 [1] : vector<16x16xf32> to vector<16xf32>
    %348 = vector.shape_cast %347 : vector<16xf32> to vector<16x1xf32>
    %cst_120 = arith.constant dense<0xFF800000> : vector<16xf32>
    %349 = vector.multi_reduction <maximumf>, %346, %cst_120 [1] : vector<16x16xf32> to vector<16xf32>
    %350 = vector.shape_cast %349 : vector<16xf32> to vector<16x1xf32>
    %351 = arith.subf %350, %348 : vector<16x1xf32>
    %cst_121 = arith.constant 0.000000e+00 : f32
    %352 = vector.broadcast %cst_121 : f32 to vector<16x1xf32>
    %353 = arith.cmpf ogt, %351, %352 : vector<16x1xf32>
    %cst_122 = arith.constant 1.000000e+00 : f32
    %354 = vector.broadcast %cst_122 : f32 to vector<16x1xf32>
    %355 = arith.select %353, %351, %354 : vector<16x1xi1>, vector<16x1xf32>
    %356 = vector.broadcast %348 : vector<16x1xf32> to vector<16x16xf32>
    %357 = arith.subf %346, %356 : vector<16x16xf32>
    %358 = vector.broadcast %355 : vector<16x1xf32> to vector<16x16xf32>
    %359 = arith.divf %357, %358 : vector<16x16xf32>
    %cst_123 = arith.constant dense<0.000000e+00> : vector<16x16xf32>
    %360 = tpu.matmul %359, %359, %cst_123 {dimension_numbers = #tpu.dot_dimension_numbers<[1], [1], [0], [0], [0, 0, 1, 0], [], []>} : vector<16x16xf32>, vector<16x16xf32>, vector<16x16xf32> -> vector<16x16xf32>
    %361 = arith.mulf %360, %23 : vector<16x16xf32>
    %cst_124 = arith.constant dense<0.000000e+00> : vector<16xf32>
    %362 = vector.multi_reduction <add>, %361, %cst_124 [1] : vector<16x16xf32> to vector<16xf32>
    %363 = vector.shape_cast %362 : vector<16xf32> to vector<16x1xf32>
    %cst_125 = arith.constant dense<0.000000e+00> : vector<16xf32>
    %364 = vector.multi_reduction <add>, %361, %cst_125 [0] : vector<16x16xf32> to vector<16xf32>
    %365 = vector.shape_cast %364 : vector<16xf32> to vector<1x16xf32>
    %366 = vector.shape_cast %363 : vector<16x1xf32> to vector<1x16x1xf32>
    %cst_126 = arith.constant dense<0.000000e+00> : vector<1xf32>
    %367 = vector.multi_reduction <add>, %366, %cst_126 [1, 2] : vector<1x16x1xf32> to vector<1xf32>
    %368 = vector.shape_cast %367 : vector<1xf32> to vector<1x1x1xf32>
    %369 = vector.extract %368[0, 0, 0] : f32 from vector<1x1x1xf32>
    %cst_127 = arith.constant 1.600000e+01 : f32
    %370 = arith.divf %369, %cst_127 : f32
    %cst_128 = arith.constant 0.000000e+00 : f32
    %371 = arith.cmpf one, %370, %cst_128 : f32
    %cst_129 = arith.constant 1.000000e+00 : f32
    %372 = arith.select %371, %370, %cst_129 : f32
    %373 = vector.broadcast %372 : f32 to vector<16x1xf32>
    %374 = arith.divf %363, %373 : vector<16x1xf32>
    %375 = vector.broadcast %372 : f32 to vector<1x16xf32>
    %376 = arith.divf %365, %375 : vector<1x16xf32>
    %377 = vector.broadcast %374 : vector<16x1xf32> to vector<16x16xf32>
    %378 = vector.broadcast %376 : vector<1x16xf32> to vector<16x16xf32>
    %379 = arith.addf %377, %378 : vector<16x16xf32>
    %380 = vector.broadcast %372 : f32 to vector<16x16xf32>
    %381 = arith.divf %360, %380 : vector<16x16xf32>
    %cst_130 = arith.constant 2.000000e+00 : f32
    %382 = vector.broadcast %cst_130 : f32 to vector<16x16xf32>
    %383 = arith.mulf %382, %381 : vector<16x16xf32>
    %384 = arith.subf %379, %383 : vector<16x16xf32>
    %cst_131 = arith.constant -5.000000e-01 : f32
    %385 = vector.broadcast %cst_131 : f32 to vector<16x16xf32>
    %386 = arith.mulf %385, %384 : vector<16x16xf32>
    %387 = math.exp %386 : vector<16x16xf32>
    %c0_132 = arith.constant 0 : index
    %388 = memref.load %arg4[%c0_132] : memref<8xf32, #tpu.memory_space<smem>>
    %c1 = arith.constant 1 : index
    %389 = memref.load %arg4[%c1] : memref<8xf32, #tpu.memory_space<smem>>
    %c2 = arith.constant 2 : index
    %390 = memref.load %arg4[%c2] : memref<8xf32, #tpu.memory_space<smem>>
    %c3 = arith.constant 3 : index
    %391 = memref.load %arg4[%c3] : memref<8xf32, #tpu.memory_space<smem>>
    %c4 = arith.constant 4 : index
    %392 = memref.load %arg4[%c4] : memref<8xf32, #tpu.memory_space<smem>>
    %c5 = arith.constant 5 : index
    %393 = memref.load %arg4[%c5] : memref<8xf32, #tpu.memory_space<smem>>
    %c6 = arith.constant 6 : index
    %394 = memref.load %arg4[%c6] : memref<8xf32, #tpu.memory_space<smem>>
    %c7 = arith.constant 7 : index
    %395 = memref.load %arg4[%c7] : memref<8xf32, #tpu.memory_space<smem>>
    %396 = vector.broadcast %388 : f32 to vector<16x16xf32>
    %397 = arith.mulf %396, %177 : vector<16x16xf32>
    %398 = vector.broadcast %389 : f32 to vector<16x16xf32>
    %399 = arith.mulf %398, %261 : vector<16x16xf32>
    %400 = arith.addf %397, %399 : vector<16x16xf32>
    %401 = vector.broadcast %390 : f32 to vector<16x16xf32>
    %402 = arith.mulf %401, %345 : vector<16x16xf32>
    %403 = arith.addf %400, %402 : vector<16x16xf32>
    %404 = vector.broadcast %391 : f32 to vector<16x16xf32>
    %405 = arith.mulf %404, %15 : vector<16x16xf32>
    %406 = arith.addf %403, %405 : vector<16x16xf32>
    %407 = math.absf %406 : vector<16x16xf32>
    %cst_133 = arith.constant 0.000000e+00 : f32
    %408 = vector.broadcast %cst_133 : f32 to vector<16x16xf32>
    %409 = arith.cmpf one, %407, %408 : vector<16x16xf32>
    %cst_134 = arith.constant 0x7F800000 : f32
    %410 = vector.broadcast %cst_134 : f32 to vector<16x16xf32>
    %411 = arith.select %409, %407, %410 : vector<16x16xi1>, vector<16x16xf32>
    %412 = vector.shape_cast %411 : vector<16x16xf32> to vector<1x16x16xf32>
    %cst_135 = arith.constant dense<0x7F800000> : vector<1xf32>
    %413 = vector.multi_reduction <minimumf>, %412, %cst_135 [1, 2] : vector<1x16x16xf32> to vector<1xf32>
    %414 = vector.shape_cast %413 : vector<1xf32> to vector<1x1x1xf32>
    %415 = vector.extract %414[0, 0, 0] : f32 from vector<1x1x1xf32>
    %cst_136 = arith.constant 3.000000e+38 : f32
    %416 = arith.cmpf olt, %415, %cst_136 : f32
    %cst_137 = arith.constant 1.000000e+00 : f32
    %417 = arith.select %416, %415, %cst_137 : f32
    %cst_138 = arith.constant 0.000000e+00 : f32
    %418 = vector.broadcast %cst_138 : f32 to vector<16x16xf32>
    %419 = arith.cmpf oeq, %407, %418 : vector<16x16xf32>
    %420 = vector.broadcast %417 : f32 to vector<16x16xf32>
    %421 = arith.select %419, %420, %407 : vector<16x16xi1>, vector<16x16xf32>
    %422 = arith.addf %388, %389 : f32
    %423 = arith.addf %422, %390 : f32
    %424 = vector.broadcast %391 : f32 to vector<16x1xf32>
    %425 = arith.mulf %424, %27 : vector<16x1xf32>
    %426 = vector.broadcast %423 : f32 to vector<16x1xf32>
    %427 = arith.addf %426, %425 : vector<16x1xf32>
    %428 = math.absf %427 : vector<16x1xf32>
    %429 = vector.broadcast %391 : f32 to vector<1x16xf32>
    %430 = arith.mulf %429, %29 : vector<1x16xf32>
    %431 = vector.broadcast %423 : f32 to vector<1x16xf32>
    %432 = arith.addf %431, %430 : vector<1x16xf32>
    %433 = math.absf %432 : vector<1x16xf32>
    %cst_139 = arith.constant 0.000000e+00 : f32
    %434 = vector.broadcast %cst_139 : f32 to vector<16x1xf32>
    %435 = arith.cmpf oeq, %428, %434 : vector<16x1xf32>
    %436 = vector.broadcast %417 : f32 to vector<16x1xf32>
    %437 = arith.select %435, %436, %428 : vector<16x1xi1>, vector<16x1xf32>
    %cst_140 = arith.constant 0.000000e+00 : f32
    %438 = vector.broadcast %cst_140 : f32 to vector<1x16xf32>
    %439 = arith.cmpf oeq, %433, %438 : vector<1x16xf32>
    %440 = vector.broadcast %417 : f32 to vector<1x16xf32>
    %441 = arith.select %439, %440, %433 : vector<1x16xi1>, vector<1x16xf32>
    %442 = math.sqrt %437 : vector<16x1xf32>
    %443 = math.sqrt %441 : vector<1x16xf32>
    %444 = vector.broadcast %442 : vector<16x1xf32> to vector<16x16xf32>
    %445 = vector.broadcast %443 : vector<1x16xf32> to vector<16x16xf32>
    %446 = arith.mulf %444, %445 : vector<16x16xf32>
    %447 = arith.divf %421, %446 : vector<16x16xf32>
    %448 = vector.broadcast %392 : f32 to vector<16x16xf32>
    %449 = arith.mulf %448, %219 : vector<16x16xf32>
    %450 = vector.broadcast %393 : f32 to vector<16x16xf32>
    %451 = arith.mulf %450, %303 : vector<16x16xf32>
    %452 = arith.addf %449, %451 : vector<16x16xf32>
    %453 = vector.broadcast %394 : f32 to vector<16x16xf32>
    %454 = arith.mulf %453, %387 : vector<16x16xf32>
    %455 = arith.addf %452, %454 : vector<16x16xf32>
    %456 = vector.broadcast %395 : f32 to vector<16x16xf32>
    %457 = arith.mulf %456, %16 : vector<16x16xf32>
    %458 = arith.addf %455, %457 : vector<16x16xf32>
    %459 = math.absf %458 : vector<16x16xf32>
    %cst_141 = arith.constant 0.000000e+00 : f32
    %460 = vector.broadcast %cst_141 : f32 to vector<16x16xf32>
    %461 = arith.cmpf one, %459, %460 : vector<16x16xf32>
    %cst_142 = arith.constant 0x7F800000 : f32
    %462 = vector.broadcast %cst_142 : f32 to vector<16x16xf32>
    %463 = arith.select %461, %459, %462 : vector<16x16xi1>, vector<16x16xf32>
    %464 = vector.shape_cast %463 : vector<16x16xf32> to vector<1x16x16xf32>
    %cst_143 = arith.constant dense<0x7F800000> : vector<1xf32>
    %465 = vector.multi_reduction <minimumf>, %464, %cst_143 [1, 2] : vector<1x16x16xf32> to vector<1xf32>
    %466 = vector.shape_cast %465 : vector<1xf32> to vector<1x1x1xf32>
    %467 = vector.extract %466[0, 0, 0] : f32 from vector<1x1x1xf32>
    %cst_144 = arith.constant 3.000000e+38 : f32
    %468 = arith.cmpf olt, %467, %cst_144 : f32
    %cst_145 = arith.constant 1.000000e+00 : f32
    %469 = arith.select %468, %467, %cst_145 : f32
    %cst_146 = arith.constant 0.000000e+00 : f32
    %470 = vector.broadcast %cst_146 : f32 to vector<16x16xf32>
    %471 = arith.cmpf oeq, %459, %470 : vector<16x16xf32>
    %472 = vector.broadcast %469 : f32 to vector<16x16xf32>
    %473 = arith.select %471, %472, %459 : vector<16x16xi1>, vector<16x16xf32>
    %474 = arith.addf %392, %393 : f32
    %475 = arith.addf %474, %394 : f32
    %476 = vector.broadcast %395 : f32 to vector<16x1xf32>
    %477 = arith.mulf %476, %31 : vector<16x1xf32>
    %478 = vector.broadcast %475 : f32 to vector<16x1xf32>
    %479 = arith.addf %478, %477 : vector<16x1xf32>
    %480 = math.absf %479 : vector<16x1xf32>
    %481 = vector.broadcast %395 : f32 to vector<1x16xf32>
    %482 = arith.mulf %481, %33 : vector<1x16xf32>
    %483 = vector.broadcast %475 : f32 to vector<1x16xf32>
    %484 = arith.addf %483, %482 : vector<1x16xf32>
    %485 = math.absf %484 : vector<1x16xf32>
    %cst_147 = arith.constant 0.000000e+00 : f32
    %486 = vector.broadcast %cst_147 : f32 to vector<16x1xf32>
    %487 = arith.cmpf oeq, %480, %486 : vector<16x1xf32>
    %488 = vector.broadcast %469 : f32 to vector<16x1xf32>
    %489 = arith.select %487, %488, %480 : vector<16x1xi1>, vector<16x1xf32>
    %cst_148 = arith.constant 0.000000e+00 : f32
    %490 = vector.broadcast %cst_148 : f32 to vector<1x16xf32>
    %491 = arith.cmpf oeq, %485, %490 : vector<1x16xf32>
    %492 = vector.broadcast %469 : f32 to vector<1x16xf32>
    %493 = arith.select %491, %492, %485 : vector<1x16xi1>, vector<1x16xf32>
    %494 = math.sqrt %489 : vector<16x1xf32>
    %495 = math.sqrt %493 : vector<1x16xf32>
    %496 = vector.broadcast %494 : vector<16x1xf32> to vector<16x16xf32>
    %497 = vector.broadcast %495 : vector<1x16xf32> to vector<16x16xf32>
    %498 = arith.mulf %496, %497 : vector<16x16xf32>
    %499 = arith.divf %473, %498 : vector<16x16xf32>
    %cst_149 = arith.constant dense<0.000000e+00> : vector<16x16xf32>
    %500 = tpu.matmul %447, %17, %cst_149 {dimension_numbers = #tpu.dot_dimension_numbers<[1], [0], [0], [1], [0, 0, 1, 1], [], []>} : vector<16x16xf32>, vector<16x16xf32>, vector<16x16xf32> -> vector<16x16xf32>
    %cst_150 = arith.constant dense<0.000000e+00> : vector<16x16xf32>
    %501 = tpu.matmul %18, %499, %cst_150 {dimension_numbers = #tpu.dot_dimension_numbers<[1], [1], [0], [0], [0, 0, 1, 0], [], []>} : vector<16x16xf32>, vector<16x16xf32>, vector<16x16xf32> -> vector<16x16xf32>
    %502 = arith.addf %500, %501 : vector<16x16xf32>
    %cst_151 = arith.constant 5.000000e-01 : f32
    %503 = vector.broadcast %cst_151 : f32 to vector<16x16xf32>
    %504 = arith.mulf %503, %502 : vector<16x16xf32>
    %c0_152 = arith.constant 0 : index
    %c0_153 = arith.constant 0 : index
    %505 = vector.load %arg5[%c0_152, %c0_153] : memref<16x16xf32, #tpu.memory_space<vmem>>, vector<16x16xf32>
    tpu.vector_store %arg5[%c0_152, %c0_153], %504 {strides = array<i32>} : memref<16x16xf32, #tpu.memory_space<vmem>>, vector<16x16xf32>,
    return
  }
}

</mosaic_0001>

<bundles_post_ra>
// kernel: model_forward.1
= control target key start
LH: loop header
LB: loop body
LE: loop exit
PB: predicated region body
PF: predicated region fallthrough
CT: control target
= control target key end

     0   :  { %10 = vsyncpa [#allocation4], 0  ;;  %s3950_s0 = inlined_call_operand.vmem [shape: f32[64,32], index: 0, kind: input, shape index: {}]   ;;  %s3951_s1 = inlined_call_operand.vmem [shape: f32[96,32], index: 1, kind: input, shape index: {}]   ;;  %s3952_s2 = inlined_call_operand.vmem [shape: f32[9,32], index: 2, kind: input, shape index: {}]   ;;  %s3953_s3 = inlined_call_operand.vmem [shape: f32[64,16], index: 3, kind: input, shape index: {}]   ;;  %s3954_s4 = inlined_call_operand.vmem [shape: f32[8], index: 4, kind: input, shape index: {}]   ;;  %s3955_s5 = inlined_call_operand.hbm [shape: f32[16,16], index: 5, kind: output, shape index: {}]  }
   0x1   :  { %11 = vsyncpa [#allocation3], 0  ;;  %s26_s20 = sshll.u32 %s3954_s4, 4  ;;  %s27_s20 = int_to_ptr.vmem [resolvable:$true] %s26_s20 }
   0x2   :  { %s3176_s21 = scalar_lea.vmem %s27_s20, 16  ;;  %p3181_p1 = scmp.lt.s32.totalorder %s27_s20, %s27_s20 }
   0x3   :  { %p3177_p0 = scmp.ne.s32.totalorder %s27_s20, %s3176_s21  ;;  %p3182_p2 = scmp.lt.s32.totalorder %s3176_s21, %s3176_s21 }
   0x5   :  { %p3183_p3 = por %p3182_p2, %p3181_p1 }
   0x7   :  { %p3184_p4 = pnand %p3183_p3, %p3177_p0 }
   0x9   :  { %3187 = shalt.err (!%p3184_p4)
}
   0xa   :  { %s3214_s22 = smov [#allocation2]  }
   0xb   :  { %29 = dma.vmem_to_smem %s27_s20, 16, %s3214_s22, [#allocation4]  }
   0xc   :  { %3210 = dma.done.wait [#allocation4], 16  }
   0xd   :  { %3211 = vsyncadd [#allocation4], 4294967280 }
   0xe   :  { %33 = sfence }
   0xf   :  { %v42_v0 = vld [vmem:[%s3951_s1] sm:$0xff]  ;;  %v43_v1 = vld [vmem:[%s3951_s1 + $0x8] sm:$0xff]  ;;  %v44_v2 = vld [vmem:[%s3951_s1 + $0x10] sm:$0xff]  ;;  %vm106_vm0 = vcmask 261120   ;;  %v3215_v10 = vmov 0.0|0.0   ;;  %vm3216_vm1 = vmmov 0   ;;  %v64_v12 = vlaneseq }
  0x10   :  { %v2905_v3 = vpack.c.bf16 %v43_v1, %v42_v0  ;;  %v45_v4 = vld [vmem:[%s3951_s1 + $0x18] sm:$0xff]  ;;  %v34_v5 = vld [vmem:[%s3950_s0] sm:$0xff]  ;;  %v35_v7 = vld [vmem:[%s3950_s0 + $0x8] sm:$0xff]  ;;  %v3217_v11 = vmov 0.0   ;;  %vm79_vm15 = vcmask 130048   ;;  %s3792_s20 = sld [smem:[#allocation2]] }
  0x11   :  { %v2909_v6 = vpack.c.bf16 %v45_v4, %v44_v2  ;;  %2740 = vmatprep.mubr.msk.f32.mxu1 %vm106_vm0, %v34_v5  ;;  %v36_v8 = vld [vmem:[%s3950_s0 + $0x10] sm:$0xff]  ;;  %v37_v9 = vld [vmem:[%s3950_s0 + $0x18] sm:$0xff]  ;;  %v3286_v13 = vshrl.u32 %v64_v12, 7  ;;  %v3292_v15 = vld [vmem:[%s3952_s2] sm:$0xff]  ;;  %s3794_s21 = sld [smem:[#allocation2 + $0x1]]  ;;  %s3796_s22 = sld [smem:[#allocation2 + $0x4]] }
  0x12   :  { %2906 = vmatprep.subr.bf16.mxu1 %v2905_v3  ;;  %vm3297_vm2 = vmpackc.low %vm106_vm0, %vm106_vm0  ;;  %v3322_v38 = vld [vmem:[%s3950_s0 + $0x20] sm:$0xff]  ;;  %v3327_v39 = vld [vmem:[%s3950_s0 + $0x28] sm:$0xff]  ;;  %s3824_s4 = sld [smem:[#allocation2 + $0x2]]  ;;  %s2626_s27 = sld [smem:[#allocation2 + $0x3]] }
  0x13   :  { %2908 = vmatpush3.bf16.msra.mxu1 %v2905_v3  ;;  %v206_v14 = vsub.s32 1, %v3286_v13  ;;  %v3316_v34 = vsub.s32 0, %v3286_v13  ;;  %vm329_vm3 = vcmp.gt.f32.partialorder %v3322_v38, 0.0  ;;  %vm330_vm4 = vcmp.gt.f32.partialorder %v3327_v39, 0.0  ;;  %v3334_v46 = vld [vmem:[%s3950_s0 + $0x30] sm:$0xff]  ;;  %v3339_v47 = vld [vmem:[%s3950_s0 + $0x38] sm:$0xff] }
  0x14   :  { %2910 = vmatprep.subr.bf16.mxu1 %v2909_v6  ;;  %vm331_vm9 = vcmp.gt.f32.partialorder %v3334_v46, 0.0  ;;  %vm332_vm10 = vcmp.gt.f32.partialorder %v3339_v47, 0.0  ;;  %s3798_s0 = sld [smem:[#allocation2 + $0x5]]  ;;  %s3835_s7 = sld [smem:[#allocation2 + $0x6]] }
  0x15   :  { %v207_v16 = vrot.slane %v3292_v15, %v206_v14  ;;  %s2630_s8 = sld [smem:[#allocation2 + $0x7]] }
  0x17   :  { %2912 = vmatpush3.bf16.msra.mxu1 %v2909_v6 }
  0x18   :  { %2913 = vmatprep.subr.bf16.mxu1 %v3215_v10 }
  0x1a   :  { %2741 = vmatmul.mubr.msk.f32.vlgmr.msra.gmra.mrb[0].mxu1 %vm106_vm0, %v35_v7 }
  0x1b   :  { %2743 = vmatprep.mubr.msk.f32.mxu1 %vm106_vm0, %v36_v8 }
  0x1e   :  { %2744 = vmatmul.mubr.msk.f32.gmra.mrb[2].mxu1 %vm106_vm0, %v37_v9 }
  0x1f   :  { %2754 = vmatprep.mubr.msk.f32.mxu1 %vm3216_vm1, %v3217_v11 }
  0xed   :  { %v2742_v17 = vpop.f32.mrb[0].mxu1 }
  0xee   :  { %v185_v18 = vpop.f32.mrb[1].mxu1  ;;  %v209_v22 = vmul.f32 %v2742_v17, %v207_v16 }
  0xef   :  { %v2914_v20 = vpack.c.bf16 %v2742_v17, %v185_v18  ;;  %v208_v21 = vmul.f32 %v207_v16, %v185_v18 }
  0xf0   :  { %v215_v29 = vsel %vm106_vm0, %v209_v22, 0.0 }
  0xf1   :  { %v2745_v23 = vpop.f32.mrb[2].mxu1  ;;  %2916 = vmatpush3.bf16.xpose.msk.msra.mxu1 %vm3297_vm2, %v2914_v20  ;;  %2922 = vmatprep.subr.bf16.mxu0 %v2914_v20  ;;  %v212_v24 = vsel %vm106_vm0, %v208_v21, 0.0 }
  0xf2   :  { %2924 = vmatpush3.bf16.msra.mxu0 %v2914_v20  ;;  %213 = vadd.xlane.f32.xlu0 %v212_v24  ;;  %v195_v25 = vpop.f32.mrb[3].mxu1  ;;  %v211_v26 = vmul.f32 %v2745_v23, %v207_v16 }
  0xf3   :  { %v2918_v27 = vpack.c.bf16 %v2745_v23, %v195_v25  ;;  %v210_v28 = vmul.f32 %v207_v16, %v195_v25  ;;  %2917 = vmatprep.subr.bf16.mxu1 %v3215_v10 }
  0xf4   :  { %v221_v31 = vsel %vm106_vm0, %v211_v26, 0.0 }
  0xf5   :  { %v218_v30 = vsel %vm106_vm0, %v210_v28, 0.0  ;;  %2926 = vmatprep.subr.bf16.mxu0 %v2918_v27 }
  0xf6   :  { %216 = vadd.xlane.f32.xlu0 %v215_v29  ;;  %219 = vadd.xlane.f32.xlu1 %v218_v30  ;;  %v46_v30 = vld [vmem:[%s3951_s1 + $0x20] sm:$0xff] }
  0xf7   :  { %2928 = vmatpush3.bf16.msra.mxu0 %v2918_v27 }
  0xf9   :  { %2920 = vmatpush3.bf16.xpose.msk.msra.mxu1 %vm3297_vm2, %v2918_v27 }
  0xfa   :  { %222 = vadd.xlane.f32.xlu1 %v221_v31  ;;  %2937 = vmatprep.subr.bf16.mxu1 %v3215_v10  ;;  %v47_v31 = vld [vmem:[%s3951_s1 + $0x28] sm:$0xff] }
 0x100   :  { %2755 = vmatmul.mubr.msk.f32.vlgmr.msra.gmra.mrb[4].mxu1 %vm106_vm0, %v3292_v15 }
 0x101   :  { %2793 = vmatprep.mubr.msk.f32.mxu1 %vm3216_vm1, %v3217_v11 }
 0x17f   :  { %v214_v32 = vpop.xlane.xlu0 %213 }
 0x183   :  { %v220_v33 = vpop.xlane.xlu1 %219  ;;  %v217_v40 = vpop.xlane.xlu0 %216 }
 0x187   :  { %v223_v41 = vpop.xlane.xlu1 %222 }
 0x1d3   :  { %v305_v35 = vpop.f32.mrb[4].mxu1 }
 0x1d4   :  { %v312_v36 = vrot.slane %v305_v35, %v3316_v34  ;;  %v2756_v37 = vpop.f32.mrb[5].mxu1 }
 0x1d6   :  { %v313_v42 = vadd.f32 %v312_v36, %v214_v32  ;;  %v314_v43 = vadd.f32 %v312_v36, %v217_v40  ;;  %v315_v44 = vadd.f32 %v312_v36, %v220_v33  ;;  %v316_v45 = vadd.f32 %v312_v36, %v223_v41 }
 0x1d7   :  { %v2929_v32 = vpack.c.bf16 %v47_v31, %v46_v30 }
 0x1d8   :  { %vm317_vm5 = vcmp.ge.f32.partialorder %v313_v42, 0.0  ;;  %v321_v48 = vmul.f32 0.2, %v313_v42  ;;  %vm318_vm6 = vcmp.ge.f32.partialorder %v314_v43, 0.0  ;;  %v322_v49 = vmul.f32 0.2, %v314_v43 }
 0x1d9   :  { %vm319_vm7 = vcmp.ge.f32.partialorder %v315_v44, 0.0  ;;  %v323_v50 = vmul.f32 0.2, %v315_v44  ;;  %vm320_vm8 = vcmp.ge.f32.partialorder %v316_v45, 0.0  ;;  %v324_v51 = vmul.f32 0.2, %v316_v45  ;;  %2930 = vmatprep.subr.bf16.mxu0 %v2929_v32 }
 0x1da   :  { %v325_v52 = vsel %vm317_vm5, %v313_v42, %v321_v48  ;;  %v326_v53 = vsel %vm318_vm6, %v314_v43, %v322_v49 }
 0x1db   :  { %v333_v54 = vsel %vm329_vm3, %v325_v52, -1e+30  ;;  %v334_v55 = vsel %vm330_vm4, %v326_v53, -1e+30  ;;  %v327_v56 = vsel %vm319_vm7, %v315_v44, %v323_v50  ;;  %v328_v57 = vsel %vm320_vm8, %v316_v45, %v324_v51  ;;  %v48_v50 = vld [vmem:[%s3951_s1 + $0x30] sm:$0xff]  ;;  %v49_v51 = vld [vmem:[%s3951_s1 + $0x38] sm:$0xff] }
 0x1dc   :  { %v337_v58 = vsel %vm106_vm0, %v333_v54, -inf  ;;  %v340_v59 = vsel %vm106_vm0, %v334_v55, -inf  ;;  %v335_v60 = vsel %vm331_vm9, %v327_v56, -1e+30  ;;  %v336_v61 = vsel %vm332_vm10, %v328_v57, -1e+30 }
 0x1dd   :  { %338 = vmax.xlane.f32.xlu0 %v337_v58  ;;  %341 = vmax.xlane.f32.xlu1 %v340_v59  ;;  %v343_v62 = vsel %vm106_vm0, %v335_v60, -inf  ;;  %v346_v63 = vsel %vm106_vm0, %v336_v61, -inf  ;;  %v2933_v52 = vpack.c.bf16 %v49_v51, %v48_v50  ;;  %v387_v53 = vsub.s32 2, %v3286_v13 }
 0x1e1   :  { %344 = vmax.xlane.f32.xlu0 %v343_v62  ;;  %347 = vmax.xlane.f32.xlu1 %v346_v63 }
 0x26a   :  { %v339_v0 = vpop.xlane.xlu0 %338  ;;  %v342_v1 = vpop.xlane.xlu1 %341 }
 0x26b   :  { %v349_v2 = vsub.f32 %v333_v54, %v339_v0  ;;  %v350_v3 = vsub.f32 %v334_v55, %v342_v1  ;;  %v388_v54 = vrot.slane %v3292_v15, %v387_v53 }
 0x26d   :  { %v353_v4 = vmul.f32 1.442695, %v349_v2  ;;  %v355_v5 = vmul.f32 1.442695, %v350_v3  ;;  %v589_v3 = vsub.s32 4, %v3286_v13 }
 0x26e   :  { %v345_v6 = vpop.xlane.xlu0 %344  ;;  %v348_v7 = vpop.xlane.xlu1 %347 }
 0x26f   :  { %3048 = vpow2.f32 %v353_v4  ;;  %v351_v8 = vsub.f32 %v335_v60, %v345_v6  ;;  %v352_v9 = vsub.f32 %v336_v61, %v348_v7  ;;  %v590_v4 = vrot.slane %v3292_v15, %v589_v3 }
 0x270   :  { %3050 = vpow2.f32 %v355_v5 }
 0x271   :  { %v357_v14 = vmul.f32 1.442695, %v351_v8  ;;  %v359_v16 = vmul.f32 1.442695, %v352_v9 }
 0x273   :  { %3052 = vpow2.f32 %v357_v14 }
 0x274   :  { %3054 = vpow2.f32 %v359_v16 }
 0x279   :  { %v3049_v17 = vpop.eup %3048 }
 0x27a   :  { %v3051_v18 = vpop.eup %3050  ;;  %v361_v20 = vsel %vm329_vm3, %v3049_v17, 0.0 }
 0x27b   :  { %v365_v21 = vsel %vm106_vm0, %v361_v20, 0.0  ;;  %v362_v22 = vsel %vm330_vm4, %v3051_v18, 0.0 }
 0x27c   :  { %366 = vadd.xlane.f32.xlu0 %v365_v21  ;;  %v368_v23 = vsel %vm106_vm0, %v362_v22, 0.0 }
 0x27d   :  { %v3053_v24 = vpop.eup %3052  ;;  %369 = vadd.xlane.f32.xlu1 %v368_v23 }
 0x27e   :  { %v3055_v25 = vpop.eup %3054  ;;  %v363_v26 = vsel %vm331_vm9, %v3053_v24, 0.0 }
 0x27f   :  { %v371_v27 = vsel %vm106_vm0, %v363_v26, 0.0  ;;  %v364_v28 = vsel %vm332_vm10, %v3055_v25, 0.0  ;;  %v607_v25 = vrot.slane %v3292_v15, 3 }
 0x280   :  { %372 = vadd.xlane.f32.xlu0 %v371_v27  ;;  %v374_v29 = vsel %vm106_vm0, %v364_v28, 0.0 }
 0x281   :  { %375 = vadd.xlane.f32.xlu1 %v374_v29 }
 0x309   :  { %v367_v33 = vpop.xlane.xlu0 %366 }
 0x30a   :  { %3056 = vrcp.f32 %v367_v33  ;;  %v370_v35 = vpop.xlane.xlu1 %369 }
 0x30b   :  { %3058 = vrcp.f32 %v370_v35 }
 0x30d   :  { %v373_v36 = vpop.xlane.xlu0 %372 }
 0x30e   :  { %3060 = vrcp.f32 %v373_v36  ;;  %v376_v37 = vpop.xlane.xlu1 %375 }
 0x30f   :  { %3062 = vrcp.f32 %v376_v37 }
 0x314   :  { %v3057_v40 = vpop.eup %3056 }
 0x315   :  { %v3059_v41 = vpop.eup %3058  ;;  %v378_v42 = vmul.f32 %v3057_v40, %v361_v20 }
 0x316   :  { %v380_v43 = vmul.f32 %v3059_v41, %v362_v22 }
 0x317   :  { %2765 = vmatprep.mubr.msk.f32.mxu0 %vm106_vm0, %v378_v42 }
 0x318   :  { %v3061_v44 = vpop.eup %3060  ;;  %2766 = vmatmul.mubr.msk.f32.vlgmr.msra.gmra.mrb[0].mxu0 %vm106_vm0, %v380_v43 }
 0x319   :  { %v3063_v45 = vpop.eup %3062  ;;  %v382_v48 = vmul.f32 %v3061_v44, %v363_v26  ;;  %2932 = vmatpush3.bf16.msra.mxu0 %v2929_v32 }
 0x31a   :  { %v384_v49 = vmul.f32 %v3063_v45, %v364_v28  ;;  %2934 = vmatprep.subr.bf16.mxu0 %v2933_v52 }
 0x31b   :  { %2768 = vmatprep.mubr.msk.f32.mxu0 %vm106_vm0, %v382_v48 }
 0x31c   :  { %2769 = vmatmul.mubr.msk.f32.gmra.mrb[2].mxu0 %vm106_vm0, %v384_v49 }
 0x31d   :  { %2936 = vmatpush3.bf16.msra.mxu0 %v2933_v52 }
 0x3eb   :  { %v2767_v55 = vpop.f32.mrb[0].mxu0 }
 0x3ec   :  { %v473_v56 = vadd.f32 %v2767_v55, %v388_v54  ;;  %v467_v57 = vpop.f32.mrb[1].mxu0 }
 0x3ed   :  { %v468_v58 = vadd.f32 %v467_v57, %v388_v54 }
 0x3ee   :  { %v3387_v61 = vmax.f32 %v473_v56, 0.0 }
 0x3ef   :  { %v3385_v59 = vmax.f32 %v468_v58, 0.0  ;;  %v2770_v60 = vpop.f32.mrb[2].mxu0 }
 0x3f0   :  { %v483_v62 = vadd.f32 %v2770_v60, %v388_v54  ;;  %v477_v63 = vpop.f32.mrb[3].mxu0 }
 0x3f1   :  { %v478_v0 = vadd.f32 %v477_v63, %v388_v54  ;;  %2779 = vmatprep.mubr.msk.f32.mxu0 %vm106_vm0, %v3385_v59  ;;  %v1248_v47 = vsel %vm106_vm0, %v3385_v59, inf  ;;  %v1254_v46 = vsel %vm106_vm0, %v3385_v59, -inf }
 0x3f2   :  { %2780 = vmatmul.mubr.msk.f32.vlgmr.msra.gmra.mrb[4].mxu0 %vm106_vm0, %v3387_v61  ;;  %v3395_v2 = vmax.f32 %v483_v62, 0.0 }
 0x3f3   :  { %v3393_v1 = vmax.f32 %v478_v0, 0.0 }
 0x3f5   :  { %2782 = vmatprep.mubr.msk.f32.mxu0 %vm106_vm0, %v3393_v1 }
 0x3f6   :  { %2783 = vmatmul.mubr.msk.f32.gmra.mrb[6].mxu0 %vm106_vm0, %v3395_v2 }
 0x4c5   :  { %v2781_v5 = vpop.f32.mrb[4].mxu0 }
 0x4c6   :  { %v592_v6 = vmul.f32 %v2781_v5, %v590_v4  ;;  %v568_v7 = vpop.f32.mrb[5].mxu0 }
 0x4c7   :  { %v591_v8 = vmul.f32 %v590_v4, %v568_v7  ;;  %v2938_v9 = vpack.c.bf16 %v2781_v5, %v568_v7 }
 0x4c8   :  { %v598_v14 = vsel %vm106_vm0, %v592_v6, 0.0 }
 0x4c9   :  { %599 = vadd.xlane.f32.xlu1 %v598_v14  ;;  %v2784_v16 = vpop.f32.mrb[6].mxu0  ;;  %2940 = vmatpush3.bf16.xpose.msk.msra.mxu1 %vm3297_vm2, %v2938_v9  ;;  %v595_v17 = vsel %vm106_vm0, %v591_v8, 0.0 }
 0x4ca   :  { %v594_v18 = vmul.f32 %v2784_v16, %v590_v4  ;;  %2946 = vmatprep.subr.bf16.mxu0 %v2938_v9  ;;  %596 = vadd.xlane.f32.xlu0 %v595_v17  ;;  %v578_v20 = vpop.f32.mrb[7].mxu0 }
 0x4cb   :  { %2948 = vmatpush3.bf16.msra.mxu0 %v2938_v9  ;;  %v593_v21 = vmul.f32 %v590_v4, %v578_v20  ;;  %v2942_v22 = vpack.c.bf16 %v2784_v16, %v578_v20  ;;  %2941 = vmatprep.subr.bf16.mxu1 %v3215_v10 }
 0x4cc   :  { %v604_v23 = vsel %vm106_vm0, %v594_v18, 0.0 }
 0x4cd   :  { %605 = vadd.xlane.f32.xlu1 %v604_v23  ;;  %2950 = vmatprep.subr.bf16.mxu0 %v2942_v22  ;;  %v601_v24 = vsel %vm106_vm0, %v593_v21, 0.0 }
 0x4ce   :  { %602 = vadd.xlane.f32.xlu0 %v601_v24 }
 0x4cf   :  { %2952 = vmatpush3.bf16.msra.mxu0 %v2942_v22 }
 0x4d1   :  { %2944 = vmatpush3.bf16.xpose.msk.msra.mxu1 %vm3297_vm2, %v2942_v22 }
 0x4d2   :  { %2961 = vmatprep.subr.bf16.mxu1 %v3215_v10 }
 0x4d8   :  { %2794 = vmatmul.mubr.msk.f32.vlgmr.msra.gmra.mrb[6].mxu1 %vm106_vm0, %v607_v25 }
 0x4d9   :  { %2832 = vmatprep.mubr.msk.f32.mxu1 %vm3216_vm1, %v3217_v11  ;;  %vm3480_vm1 = vmpackc.low %vm79_vm15, %vm79_vm15 }
 0x556   :  { %v600_v26 = vpop.xlane.xlu1 %599 }
 0x557   :  { %v597_v27 = vpop.xlane.xlu0 %596 }
 0x55a   :  { %v606_v31 = vpop.xlane.xlu1 %605 }
 0x55b   :  { %v603_v32 = vpop.xlane.xlu0 %602 }
 0x5ab   :  { %v688_v28 = vpop.f32.mrb[6].mxu1 }
 0x5ac   :  { %v695_v29 = vrot.slane %v688_v28, %v3316_v34  ;;  %v2795_v30 = vpop.f32.mrb[7].mxu1  ;;  %v50_v28 = vld [vmem:[%s3951_s1 + $0x40] sm:$0xff] }
 0x5ae   :  { %v697_v33 = vadd.f32 %v695_v29, %v600_v26  ;;  %v696_v35 = vadd.f32 %v695_v29, %v597_v27  ;;  %v699_v36 = vadd.f32 %v695_v29, %v606_v31  ;;  %v698_v37 = vadd.f32 %v695_v29, %v603_v32  ;;  %v51_v29 = vld [vmem:[%s3951_s1 + $0x48] sm:$0xff] }
 0x5af   :  { %v2953_v30 = vpack.c.bf16 %v51_v29, %v50_v28  ;;  %v986_v28 = vrot.slane %v3292_v15, 6 }
 0x5b0   :  { %vm701_vm11 = vcmp.ge.f32.partialorder %v697_v33, 0.0  ;;  %v705_v40 = vmul.f32 0.2, %v697_v33  ;;  %vm700_vm12 = vcmp.ge.f32.partialorder %v696_v35, 0.0  ;;  %v704_v41 = vmul.f32 0.2, %v696_v35 }
 0x5b1   :  { %vm703_vm13 = vcmp.ge.f32.partialorder %v699_v36, 0.0  ;;  %v707_v42 = vmul.f32 0.2, %v699_v36  ;;  %vm702_vm14 = vcmp.ge.f32.partialorder %v698_v37, 0.0  ;;  %v706_v43 = vmul.f32 0.2, %v698_v37  ;;  %2954 = vmatprep.subr.bf16.mxu0 %v2953_v30 }
 0x5b2   :  { %v709_v44 = vsel %vm701_vm11, %v697_v33, %v705_v40  ;;  %v708_v45 = vsel %vm700_vm12, %v696_v35, %v704_v41 }
 0x5b3   :  { %v713_v48 = vsel %vm330_vm4, %v709_v44, -1e+30  ;;  %v712_v49 = vsel %vm329_vm3, %v708_v45, -1e+30  ;;  %v711_v50 = vsel %vm703_vm13, %v699_v36, %v707_v42  ;;  %v710_v51 = vsel %vm702_vm14, %v698_v37, %v706_v43 }
 0x5b4   :  { %v719_v52 = vsel %vm106_vm0, %v713_v48, -inf  ;;  %v716_v53 = vsel %vm106_vm0, %v712_v49, -inf  ;;  %v715_v54 = vsel %vm332_vm10, %v711_v50, -1e+30  ;;  %v714_v55 = vsel %vm331_vm9, %v710_v51, -1e+30 }
 0x5b5   :  { %720 = vmax.xlane.f32.xlu1 %v719_v52  ;;  %717 = vmax.xlane.f32.xlu0 %v716_v53  ;;  %v725_v56 = vsel %vm106_vm0, %v715_v54, -inf  ;;  %v722_v57 = vsel %vm106_vm0, %v714_v55, -inf  ;;  %v766_v51 = vsub.s32 5, %v3286_v13 }
 0x5b7   :  { %v767_v52 = vrot.slane %v3292_v15, %v766_v51 }
 0x5b9   :  { %726 = vmax.xlane.f32.xlu1 %v725_v56  ;;  %723 = vmax.xlane.f32.xlu0 %v722_v57 }
 0x642   :  { %v721_v58 = vpop.xlane.xlu1 %720  ;;  %v718_v60 = vpop.xlane.xlu0 %717 }
 0x643   :  { %v729_v62 = vsub.f32 %v713_v48, %v721_v58  ;;  %v728_v63 = vsub.f32 %v712_v49, %v718_v60  ;;  %v52_v48 = vld [vmem:[%s3951_s1 + $0x50] sm:$0xff]  ;;  %v53_v49 = vld [vmem:[%s3951_s1 + $0x58] sm:$0xff] }
 0x644   :  { %v2957_v50 = vpack.c.bf16 %v53_v49, %v52_v48 }
 0x645   :  { %v734_v0 = vmul.f32 1.442695, %v729_v62  ;;  %v732_v3 = vmul.f32 1.442695, %v728_v63 }
 0x646   :  { %v727_v4 = vpop.xlane.xlu1 %726  ;;  %v724_v5 = vpop.xlane.xlu0 %723 }
 0x647   :  { %3064 = vpow2.f32 %v734_v0  ;;  %v731_v6 = vsub.f32 %v715_v54, %v727_v4  ;;  %v730_v7 = vsub.f32 %v714_v55, %v724_v5  ;;  %v968_v5 = vsub.s32 7, %v3286_v13 }
 0x648   :  { %3066 = vpow2.f32 %v732_v3 }
 0x649   :  { %v738_v8 = vmul.f32 1.442695, %v731_v6  ;;  %v736_v9 = vmul.f32 1.442695, %v730_v7  ;;  %v969_v6 = vrot.slane %v3292_v15, %v968_v5 }
 0x64b   :  { %3068 = vpow2.f32 %v738_v8 }
 0x64c   :  { %3070 = vpow2.f32 %v736_v9 }
 0x651   :  { %v3065_v14 = vpop.eup %3064 }
 0x652   :  { %v3067_v16 = vpop.eup %3066  ;;  %v741_v17 = vsel %vm330_vm4, %v3065_v14, 0.0 }
 0x653   :  { %v747_v18 = vsel %vm106_vm0, %v741_v17, 0.0  ;;  %v740_v20 = vsel %vm329_vm3, %v3067_v16, 0.0 }
 0x654   :  { %748 = vadd.xlane.f32.xlu1 %v747_v18  ;;  %v744_v21 = vsel %vm106_vm0, %v740_v20, 0.0 }
 0x655   :  { %v3069_v22 = vpop.eup %3068  ;;  %745 = vadd.xlane.f32.xlu0 %v744_v21 }
 0x656   :  { %v3071_v23 = vpop.eup %3070  ;;  %v743_v24 = vsel %vm332_vm10, %v3069_v22, 0.0 }
 0x657   :  { %v753_v25 = vsel %vm106_vm0, %v743_v24, 0.0  ;;  %v742_v26 = vsel %vm331_vm9, %v3071_v23, 0.0 }
 0x658   :  { %754 = vadd.xlane.f32.xlu1 %v753_v25  ;;  %v750_v27 = vsel %vm106_vm0, %v742_v26, 0.0 }
 0x659   :  { %751 = vadd.xlane.f32.xlu0 %v750_v27 }
 0x6e1   :  { %v749_v31 = vpop.xlane.xlu1 %748 }
 0x6e2   :  { %3072 = vrcp.f32 %v749_v31  ;;  %v746_v32 = vpop.xlane.xlu0 %745 }
 0x6e3   :  { %3074 = vrcp.f32 %v746_v32 }
 0x6e5   :  { %v755_v33 = vpop.xlane.xlu1 %754 }
 0x6e6   :  { %3076 = vrcp.f32 %v755_v33  ;;  %v752_v35 = vpop.xlane.xlu0 %751 }
 0x6e7   :  { %3078 = vrcp.f32 %v752_v35 }
 0x6ec   :  { %v3073_v36 = vpop.eup %3072 }
 0x6ed   :  { %v3075_v37 = vpop.eup %3074  ;;  %v759_v40 = vmul.f32 %v3073_v36, %v741_v17 }
 0x6ee   :  { %v757_v41 = vmul.f32 %v3075_v37, %v740_v20 }
 0x6f0   :  { %v3077_v42 = vpop.eup %3076  ;;  %2804 = vmatprep.mubr.msk.f32.mxu0 %vm106_vm0, %v757_v41 }
 0x6f1   :  { %v3079_v43 = vpop.eup %3078  ;;  %2805 = vmatmul.mubr.msk.f32.vlgmr.msra.gmra.mrb[8].mxu0 %vm106_vm0, %v759_v40  ;;  %v763_v44 = vmul.f32 %v3077_v42, %v743_v24 }
 0x6f2   :  { %v761_v45 = vmul.f32 %v3079_v43, %v742_v26  ;;  %2956 = vmatpush3.bf16.msra.mxu0 %v2953_v30 }
 0x6f3   :  { %2958 = vmatprep.subr.bf16.mxu0 %v2957_v50 }
 0x6f4   :  { %2807 = vmatprep.mubr.msk.f32.mxu0 %vm106_vm0, %v761_v45 }
 0x6f5   :  { %2808 = vmatmul.mubr.msk.f32.gmra.mrb[10].mxu0 %vm106_vm0, %v763_v44 }
 0x6f6   :  { %2960 = vmatpush3.bf16.msra.mxu0 %v2957_v50 }
 0x7c4   :  { %v2806_v53 = vpop.f32.mrb[8].mxu0 }
 0x7c5   :  { %v852_v54 = vadd.f32 %v2806_v53, %v767_v52  ;;  %v846_v55 = vpop.f32.mrb[9].mxu0 }
 0x7c6   :  { %v847_v56 = vadd.f32 %v846_v55, %v767_v52 }
 0x7c7   :  { %v3462_v60 = vmax.f32 %v852_v54, 0.0 }
 0x7c8   :  { %v3460_v57 = vmax.f32 %v847_v56, 0.0  ;;  %v2809_v58 = vpop.f32.mrb[10].mxu0 }
 0x7c9   :  { %v862_v62 = vadd.f32 %v2809_v58, %v767_v52  ;;  %v856_v63 = vpop.f32.mrb[11].mxu0 }
 0x7ca   :  { %v857_v0 = vadd.f32 %v856_v63, %v767_v52  ;;  %2818 = vmatprep.mubr.msk.f32.mxu0 %vm106_vm0, %v3460_v57 }
 0x7cb   :  { %2819 = vmatmul.mubr.msk.f32.vlgmr.msra.gmra.mrb[12].mxu0 %vm106_vm0, %v3462_v60  ;;  %v3470_v4 = vmax.f32 %v862_v62, 0.0 }
 0x7cc   :  { %v3468_v3 = vmax.f32 %v857_v0, 0.0 }
 0x7ce   :  { %2821 = vmatprep.mubr.msk.f32.mxu0 %vm106_vm0, %v3468_v3 }
 0x7cf   :  { %2822 = vmatmul.mubr.msk.f32.gmra.mrb[14].mxu0 %vm106_vm0, %v3470_v4 }
 0x89e   :  { %v2820_v7 = vpop.f32.mrb[12].mxu0 }
 0x89f   :  { %v971_v8 = vmul.f32 %v2820_v7, %v969_v6  ;;  %v947_v9 = vpop.f32.mrb[13].mxu0 }
 0x8a0   :  { %v970_v16 = vmul.f32 %v969_v6, %v947_v9  ;;  %v2962_v17 = vpack.c.bf16 %v2820_v7, %v947_v9 }
 0x8a1   :  { %v977_v18 = vsel %vm79_vm15, %v971_v8, 0.0 }
 0x8a2   :  { %978 = vadd.xlane.f32.xlu1 %v977_v18  ;;  %v2823_v20 = vpop.f32.mrb[14].mxu0  ;;  %2964 = vmatpush3.bf16.xpose.msk.msra.mxu1 %vm3480_vm1, %v2962_v17  ;;  %v974_v21 = vsel %vm79_vm15, %v970_v16, 0.0 }
 0x8a3   :  { %v973_v22 = vmul.f32 %v2823_v20, %v969_v6  ;;  %2970 = vmatprep.subr.bf16.mxu0 %v2962_v17  ;;  %975 = vadd.xlane.f32.xlu0 %v974_v21  ;;  %v957_v23 = vpop.f32.mrb[15].mxu0 }
 0x8a4   :  { %2972 = vmatpush3.bf16.msra.mxu0 %v2962_v17  ;;  %v972_v24 = vmul.f32 %v969_v6, %v957_v23  ;;  %v2966_v25 = vpack.c.bf16 %v2823_v20, %v957_v23  ;;  %2965 = vmatprep.subr.bf16.mxu1 %v3215_v10 }
 0x8a5   :  { %v983_v26 = vsel %vm79_vm15, %v973_v22, 0.0 }
 0x8a6   :  { %984 = vadd.xlane.f32.xlu1 %v983_v26  ;;  %2974 = vmatprep.subr.bf16.mxu0 %v2966_v25  ;;  %v980_v27 = vsel %vm79_vm15, %v972_v24, 0.0 }
 0x8a7   :  { %981 = vadd.xlane.f32.xlu0 %v980_v27 }
 0x8a8   :  { %2976 = vmatpush3.bf16.msra.mxu0 %v2966_v25 }
 0x8aa   :  { %2968 = vmatpush3.bf16.xpose.msk.msra.mxu1 %vm3480_vm1, %v2966_v25 }
 0x8b1   :  { %2833 = vmatmul.mubr.msk.f32.vlgmr.msra.gmra.mrb[8].mxu1 %vm79_vm15, %v986_v28 }
 0x92f   :  { %v979_v29 = vpop.xlane.xlu1 %978 }
 0x930   :  { %v976_v30 = vpop.xlane.xlu0 %975 }
 0x933   :  { %v985_v33 = vpop.xlane.xlu1 %984 }
 0x934   :  { %v982_v35 = vpop.xlane.xlu0 %981 }
 0x984   :  { %v1067_v31 = vpop.f32.mrb[8].mxu1 }
 0x985   :  { %v1074_v10 = vrot.slane %v1067_v31, %v3316_v34  ;;  %v2834_v32 = vpop.f32.mrb[9].mxu1  ;;  %v1251_v31 = vsel %vm106_vm0, %v3387_v61, inf }
 0x986   :  { %v1408_v32 = vsel %vm106_vm0, %v3395_v2, inf }
 0x987   :  { %v1076_v36 = vadd.f32 %v1074_v10, %v979_v29  ;;  %v1075_v37 = vadd.f32 %v1074_v10, %v976_v30  ;;  %v1078_v40 = vadd.f32 %v1074_v10, %v985_v33  ;;  %v1077_v41 = vadd.f32 %v1074_v10, %v982_v35 }
 0x988   :  { %v1257_v10 = vsel %vm106_vm0, %v3387_v61, -inf  ;;  %v1405_v33 = vsel %vm106_vm0, %v3393_v1, inf  ;;  %v1414_v35 = vsel %vm106_vm0, %v3395_v2, -inf }
 0x989   :  { %vm1080_vm5 = vcmp.ge.f32.partialorder %v1076_v36, 0.0  ;;  %v1084_v42 = vmul.f32 0.2, %v1076_v36  ;;  %vm1079_vm6 = vcmp.ge.f32.partialorder %v1075_v37, 0.0  ;;  %v1083_v43 = vmul.f32 0.2, %v1075_v37 }
 0x98a   :  { %vm1082_vm7 = vcmp.ge.f32.partialorder %v1078_v40, 0.0  ;;  %v1086_v15 = vmul.f32 0.2, %v1078_v40  ;;  %vm1081_vm8 = vcmp.ge.f32.partialorder %v1077_v41, 0.0  ;;  %v1085_v44 = vmul.f32 0.2, %v1077_v41 }
 0x98b   :  { %v1088_v45 = vsel %vm1080_vm5, %v1076_v36, %v1084_v42  ;;  %v1087_v48 = vsel %vm1079_vm6, %v1075_v37, %v1083_v43  ;;  %v1411_v36 = vsel %vm106_vm0, %v3393_v1, -inf  ;;  %v1564_v37 = vsel %vm106_vm0, %v3462_v60, inf }
 0x98c   :  { %v1092_v34 = vsel %vm330_vm4, %v1088_v45, -1e+30  ;;  %v1091_v49 = vsel %vm329_vm3, %v1087_v48, -1e+30  ;;  %v1090_v50 = vsel %vm1082_vm7, %v1078_v40, %v1086_v15  ;;  %v1089_v51 = vsel %vm1081_vm8, %v1077_v41, %v1085_v44 }
 0x98d   :  { %v1098_v52 = vsel %vm106_vm0, %v1092_v34, -inf  ;;  %v1095_v53 = vsel %vm106_vm0, %v1091_v49, -inf  ;;  %v1094_v54 = vsel %vm332_vm10, %v1090_v50, -1e+30  ;;  %v1093_v55 = vsel %vm331_vm9, %v1089_v51, -1e+30 }
 0x98e   :  { %1099 = vmax.xlane.f32.xlu1 %v1098_v52  ;;  %1096 = vmax.xlane.f32.xlu0 %v1095_v53  ;;  %v1104_v56 = vsel %vm106_vm0, %v1094_v54, -inf  ;;  %v1101_v58 = vsel %vm106_vm0, %v1093_v55, -inf  ;;  %v1561_v40 = vsel %vm106_vm0, %v3460_v57, inf  ;;  %v1570_v41 = vsel %vm106_vm0, %v3462_v60, -inf }
 0x98f   :  { %v1567_v42 = vsel %vm106_vm0, %v3460_v57, -inf  ;;  %v1720_v43 = vsel %vm106_vm0, %v3470_v4, inf  ;;  %v1717_v15 = vsel %vm106_vm0, %v3468_v3, inf  ;;  %v1726_v44 = vsel %vm106_vm0, %v3470_v4, -inf }
 0x990   :  { %v1723_v45 = vsel %vm106_vm0, %v3468_v3, -inf }
 0x992   :  { %1105 = vmax.xlane.f32.xlu1 %v1104_v56  ;;  %1102 = vmax.xlane.f32.xlu0 %v1101_v58 }
 0xa1b   :  { %v1100_v62 = vpop.xlane.xlu1 %1099  ;;  %v1097_v63 = vpop.xlane.xlu0 %1096 }
 0xa1c   :  { %v1108_v0 = vsub.f32 %v1092_v34, %v1100_v62  ;;  %v1107_v5 = vsub.f32 %v1091_v49, %v1097_v63 }
 0xa1e   :  { %v1113_v6 = vmul.f32 1.442695, %v1108_v0  ;;  %v1111_v7 = vmul.f32 1.442695, %v1107_v5 }
 0xa1f   :  { %v1106_v8 = vpop.xlane.xlu1 %1105  ;;  %v1103_v9 = vpop.xlane.xlu0 %1102 }
 0xa20   :  { %3080 = vpow2.f32 %v1113_v6  ;;  %v1110_v16 = vsub.f32 %v1094_v54, %v1106_v8  ;;  %v1109_v17 = vsub.f32 %v1093_v55, %v1103_v9 }
 0xa21   :  { %3082 = vpow2.f32 %v1111_v7 }
 0xa22   :  { %v1117_v18 = vmul.f32 1.442695, %v1110_v16  ;;  %v1115_v20 = vmul.f32 1.442695, %v1109_v17 }
 0xa24   :  { %3084 = vpow2.f32 %v1117_v18 }
 0xa25   :  { %3086 = vpow2.f32 %v1115_v20 }
 0xa2a   :  { %v3081_v21 = vpop.eup %3080 }
 0xa2b   :  { %v3083_v22 = vpop.eup %3082  ;;  %v1120_v23 = vsel %vm330_vm4, %v3081_v21, 0.0 }
 0xa2c   :  { %v1126_v24 = vsel %vm106_vm0, %v1120_v23, 0.0  ;;  %v1119_v25 = vsel %vm329_vm3, %v3083_v22, 0.0 }
 0xa2d   :  { %1127 = vadd.xlane.f32.xlu1 %v1126_v24  ;;  %v1123_v26 = vsel %vm106_vm0, %v1119_v25, 0.0 }
 0xa2e   :  { %v3085_v27 = vpop.eup %3084  ;;  %1124 = vadd.xlane.f32.xlu0 %v1123_v26 }
 0xa2f   :  { %v3087_v28 = vpop.eup %3086  ;;  %v3516_v29 = vsel %vm332_vm10, %v3085_v27, 0.0 }
 0xa30   :  { %v1132_v30 = vsel %vm106_vm0, %v3516_v29, 0.0  ;;  %v3522_v39 = vsel %vm331_vm9, %v3087_v28, 0.0 }
 0xa31   :  { %1133 = vadd.xlane.f32.xlu1 %v1132_v30  ;;  %v1129_v38 = vsel %vm106_vm0, %v3522_v39, 0.0 }
 0xa32   :  { %1130 = vadd.xlane.f32.xlu0 %v1129_v38 }
 0xa35   :  { %1252 = vmin.xlane.f32.xlu1 %v1251_v31 }
 0xa36   :  { %1249 = vmin.xlane.f32.xlu0 %v1248_v47 }
 0xa39   :  { %1258 = vmax.xlane.f32.xlu1 %v1257_v10 }
 0xa3a   :  { %1255 = vmax.xlane.f32.xlu0 %v1254_v46 }
 0xa3d   :  { %1409 = vmin.xlane.f32.xlu1 %v1408_v32 }
 0xa3e   :  { %1406 = vmin.xlane.f32.xlu0 %v1405_v33 }
 0xa41   :  { %1415 = vmax.xlane.f32.xlu1 %v1414_v35 }
 0xa42   :  { %1412 = vmax.xlane.f32.xlu0 %v1411_v36 }
 0xa45   :  { %1565 = vmin.xlane.f32.xlu1 %v1564_v37 }
 0xa46   :  { %1562 = vmin.xlane.f32.xlu0 %v1561_v40 }
 0xa49   :  { %1571 = vmax.xlane.f32.xlu1 %v1570_v41 }
 0xa4a   :  { %1568 = vmax.xlane.f32.xlu0 %v1567_v42 }
 0xa4d   :  { %1721 = vmin.xlane.f32.xlu1 %v1720_v43 }
 0xa4e   :  { %1718 = vmin.xlane.f32.xlu0 %v1717_v15 }
 0xa51   :  { %1727 = vmax.xlane.f32.xlu1 %v1726_v44 }
 0xa52   :  { %1724 = vmax.xlane.f32.xlu0 %v1723_v45 }
 0xaba   :  { %v1128_v48 = vpop.xlane.xlu1 %1127 }
 0xabb   :  { %3088 = vrcp.f32 %v1128_v48  ;;  %v1125_v34 = vpop.xlane.xlu0 %1124 }
 0xabc   :  { %3090 = vrcp.f32 %v1125_v34 }
 0xabe   :  { %v1134_v49 = vpop.xlane.xlu1 %1133 }
 0xabf   :  { %3092 = vrcp.f32 %v1134_v49  ;;  %v1131_v50 = vpop.xlane.xlu0 %1130 }
 0xac0   :  { %3094 = vrcp.f32 %v1131_v50 }
 0xac2   :  { %v1253_v51 = vpop.xlane.xlu1 %1252 }
 0xac3   :  { %v1250_v52 = vpop.xlane.xlu0 %1249  ;;  %v1267_v28 = vsub.f32 %v3387_v61, %v1253_v51 }
 0xac4   :  { %v1266_v30 = vsub.f32 %v3385_v59, %v1250_v52 }
 0xac5   :  { %v3089_v53 = vpop.eup %3088 }
 0xac6   :  { %v3091_v54 = vpop.eup %3090  ;;  %v1138_v55 = vmul.f32 %v3089_v53, %v1120_v23  ;;  %v1259_v56 = vpop.xlane.xlu1 %1258 }
 0xac7   :  { %v1261_v58 = vsub.f32 %v1259_v56, %v1253_v51  ;;  %v1256_v62 = vpop.xlane.xlu0 %1255  ;;  %v1136_v63 = vmul.f32 %v3091_v54, %v1119_v25 }
 0xac8   :  { %v1260_v0 = vsub.f32 %v1256_v62, %v1250_v52 }
 0xac9   :  { %v3093_v5 = vpop.eup %3092  ;;  %vm1263_vm3 = vcmp.gt.f32.partialorder %v1261_v58, 0.0  ;;  %2843 = vmatprep.mubr.msk.f32.mxu0 %vm106_vm0, %v1136_v63 }
 0xaca   :  { %v3095_v6 = vpop.eup %3094  ;;  %v1265_v7 = vsel %vm1263_vm3, %v1261_v58, 1.0  ;;  %vm1262_vm4 = vcmp.gt.f32.partialorder %v1260_v0, 0.0  ;;  %2844 = vmatmul.mubr.msk.f32.vlgmr.msra.gmra.mrb[16].mxu0 %vm106_vm0, %v1138_v55  ;;  %v1410_v8 = vpop.xlane.xlu1 %1409  ;;  %v1142_v9 = vmul.f32 %v3093_v5, %v3516_v29  ;;  %vm1368_vm3 = vcmask 7168  }
 0xacb   :  { %3096 = vrcp.f32 %v1265_v7  ;;  %v1264_v16 = vsel %vm1262_vm4, %v1260_v0, 1.0  ;;  %v1407_v17 = vpop.xlane.xlu0 %1406  ;;  %v1140_v18 = vmul.f32 %v3095_v6, %v3522_v39  ;;  %v1424_v37 = vsub.f32 %v3395_v2, %v1410_v8 }
 0xacc   :  { %3098 = vrcp.f32 %v1264_v16  ;;  %v1423_v41 = vsub.f32 %v3393_v1, %v1407_v17 }
 0xacd   :  { %2846 = vmatprep.mubr.msk.f32.mxu0 %vm106_vm0, %v1140_v18 }
 0xace   :  { %2847 = vmatmul.mubr.msk.f32.gmra.mrb[18].mxu0 %vm106_vm0, %v1142_v9  ;;  %v1416_v20 = vpop.xlane.xlu1 %1415 }
 0xacf   :  { %v1418_v21 = vsub.f32 %v1416_v20, %v1410_v8  ;;  %v1413_v22 = vpop.xlane.xlu0 %1412 }
 0xad0   :  { %v1417_v23 = vsub.f32 %v1413_v22, %v1407_v17 }
 0xad1   :  { %vm1420_vm9 = vcmp.gt.f32.partialorder %v1418_v21, 0.0 }
 0xad2   :  { %v1422_v24 = vsel %vm1420_vm9, %v1418_v21, 1.0  ;;  %vm1419_vm10 = vcmp.gt.f32.partialorder %v1417_v23, 0.0  ;;  %v1566_v25 = vpop.xlane.xlu1 %1565 }
 0xad3   :  { %3100 = vrcp.f32 %v1422_v24  ;;  %v1421_v26 = vsel %vm1419_vm10, %v1417_v23, 1.0  ;;  %v1563_v27 = vpop.xlane.xlu0 %1562  ;;  %v1580_v1 = vsub.f32 %v3462_v60, %v1566_v25 }
 0xad4   :  { %3102 = vrcp.f32 %v1421_v26  ;;  %v1579_v52 = vsub.f32 %v3460_v57, %v1563_v27 }
 0xad5   :  { %v3097_v29 = vpop.eup %3096 }
 0xad6   :  { %v3099_v39 = vpop.eup %3098  ;;  %v1572_v38 = vpop.xlane.xlu1 %1571  ;;  %v1271_v31 = vmul.f32 %v3097_v29, %v1267_v28  ;;  %v66_v29 = vadd.s32 8, %v3286_v13 }
 0xad7   :  { %v1574_v47 = vsub.f32 %v1572_v38, %v1566_v25  ;;  %v1569_v10 = vpop.xlane.xlu0 %1568  ;;  %v1269_v46 = vmul.f32 %v3099_v39, %v1266_v30  ;;  %v68_v30 = vand.u32 127, %v64_v12 }
 0xad8   :  { %v1573_v32 = vsub.f32 %v1569_v10, %v1563_v27 }
 0xad9   :  { %vm1576_vm11 = vcmp.gt.f32.partialorder %v1574_v47, 0.0  ;;  %2853 = vmatprep.mubr.msk.f32.mxu0 %vm106_vm0, %v1269_v46  ;;  %v2977_v33 = vpack.c.bf16 %v1271_v31, %v1269_v46 }
 0xada   :  { %v1578_v35 = vsel %vm1576_vm11, %v1574_v47, 1.0  ;;  %vm1575_vm12 = vcmp.gt.f32.partialorder %v1573_v32, 0.0  ;;  %v1722_v36 = vpop.xlane.xlu1 %1721 }
 0xadb   :  { %3104 = vrcp.f32 %v1578_v35  ;;  %v1577_v61 = vsel %vm1575_vm12, %v1573_v32, 1.0  ;;  %2979 = vmatprep.subr.msk.bf16.mxu0 %vm3297_vm2, %v2977_v33  ;;  %v1719_v59 = vpop.xlane.xlu0 %1718  ;;  %v1736_v60 = vsub.f32 %v3470_v4, %v1722_v36 }
 0xadc   :  { %3106 = vrcp.f32 %v1577_v61  ;;  %2982 = vmatpush3.bf16.xpose.msk.msra.mxu0 %vm3297_vm2, %v2977_v33  ;;  %v1735_v62 = vsub.f32 %v3468_v3, %v1719_v59  ;;  %v2595_v3 = vld [vmem:[%s3952_s2 + $0x8] ss:$0 sm:$0xff] }
 0xadd   :  { %v3101_v40 = vpop.eup %3100 }
 0xade   :  { %v3103_v42 = vpop.eup %3102  ;;  %v1728_v43 = vpop.xlane.xlu1 %1727  ;;  %v1428_v15 = vmul.f32 %v3101_v40, %v1424_v37 }
 0xadf   :  { %v1730_v44 = vsub.f32 %v1728_v43, %v1722_v36  ;;  %v1725_v45 = vpop.xlane.xlu0 %1724  ;;  %v1426_v48 = vmul.f32 %v3103_v42, %v1423_v41 }
 0xae0   :  { %v1729_v34 = vsub.f32 %v1725_v45, %v1719_v59 }
 0xae1   :  { %vm1732_vm13 = vcmp.gt.f32.partialorder %v1730_v44, 0.0  ;;  %2860 = vmatprep.mubr.msk.f32.mxu1 %vm106_vm0, %v1426_v48  ;;  %v2983_v49 = vpack.c.bf16 %v1428_v15, %v1426_v48 }
 0xae2   :  { %v1734_v50 = vsel %vm1732_vm13, %v1730_v44, 1.0  ;;  %vm1731_vm14 = vcmp.gt.f32.partialorder %v1729_v34, 0.0 }
 0xae3   :  { %3108 = vrcp.f32 %v1734_v50  ;;  %v1733_v2 = vsel %vm1731_vm14, %v1729_v34, 1.0  ;;  %2854 = vmatmul.mubr.msk.f32.vlgmr.msra.gmra.mrb[20].mxu0 %vm106_vm0, %v1271_v31  ;;  %2985 = vmatprep.subr.msk.bf16.mxu1 %vm3297_vm2, %v2983_v49 }
 0xae4   :  { %3110 = vrcp.f32 %v1733_v2  ;;  %2988 = vmatpush3.bf16.xpose.msk.msra.mxu1 %vm3297_vm2, %v2983_v49 }
 0xae5   :  { %v3105_v51 = vpop.eup %3104 }
 0xae6   :  { %v3107_v53 = vpop.eup %3106  ;;  %v1584_v54 = vmul.f32 %v3105_v51, %v1580_v1 }
 0xae7   :  { %v1582_v55 = vmul.f32 %v3107_v53, %v1579_v52 }
 0xae9   :  { %2867 = vmatprep.mubr.msk.f32.mxu0 %vm106_vm0, %v1582_v55  ;;  %v2989_v56 = vpack.c.bf16 %v1584_v54, %v1582_v55 }
 0xaeb   :  { %2861 = vmatmul.mubr.msk.f32.vlgmr.msra.gmra.mrb[10].mxu1 %vm106_vm0, %v1428_v15  ;;  %2991 = vmatprep.subr.msk.bf16.mxu0 %vm3297_vm2, %v2989_v56 }
 0xaec   :  { %2994 = vmatpush3.bf16.xpose.msk.msra.mxu0 %vm3297_vm2, %v2989_v56 }
 0xaed   :  { %v3109_v58 = vpop.eup %3108 }
 0xaee   :  { %v3111_v57 = vpop.eup %3110  ;;  %v1740_v63 = vmul.f32 %v3109_v58, %v1736_v60 }
 0xaef   :  { %v1738_v0 = vmul.f32 %v3111_v57, %v1735_v62 }
 0xaf1   :  { %2874 = vmatprep.mubr.msk.f32.mxu1 %vm106_vm0, %v1738_v0  ;;  %v2995_v5 = vpack.c.bf16 %v1740_v63, %v1738_v0 }
 0xaf3   :  { %2868 = vmatmul.mubr.msk.f32.vlgmr.msra.gmra.mrb[22].mxu0 %vm106_vm0, %v1584_v54  ;;  %2997 = vmatprep.subr.msk.bf16.mxu1 %vm3297_vm2, %v2995_v5 }
 0xaf4   :  { %3000 = vmatpush3.bf16.xpose.msk.msra.mxu1 %vm3297_vm2, %v2995_v5  ;;  %vm69_vm2 = vcmp.eq.s32.totalorder %v3286_v13, %v68_v30 }
 0xaf5   :  { %v3630_v47 = vsel %vm69_vm2, 1.0, %v3217_v11 }
 0xafb   :  { %2875 = vmatmul.mubr.msk.f32.vlgmr.msra.gmra.mrb[12].mxu1 %vm106_vm0, %v1740_v63  ;;  %vm70_vm0 = vcmp.eq.s32.totalorder %v66_v29, %v68_v30 }
 0xafc   :  { %v3627_v31 = vsel %vm70_vm0, 1.0, %v3217_v11 }
 0xb9d   :  { %v2845_v4 = vpop.f32.mrb[16].mxu0 }
 0xb9e   :  { %v1231_v6 = vadd.f32 %v2845_v4, %v2595_v3  ;;  %v1225_v7 = vpop.f32.mrb[17].mxu0 }
 0xb9f   :  { %v1226_v8 = vadd.f32 %v2595_v3, %v1225_v7 }
 0xba0   :  { %v3599_v9 = vmax.f32 %v1231_v6, 0.0 }
 0xba1   :  { %v3601_v16 = vmax.f32 %v1226_v8, 0.0  ;;  %v2848_v17 = vpop.f32.mrb[18].mxu0 }
 0xba2   :  { %v1241_v18 = vadd.f32 %v2848_v17, %v2595_v3  ;;  %v1235_v20 = vpop.f32.mrb[19].mxu0  ;;  %v1876_v19 = vsel %vm79_vm15, %v3599_v9, inf  ;;  %v1882_v24 = vsel %vm79_vm15, %v3599_v9, -inf }
 0xba3   :  { %v1236_v21 = vadd.f32 %v2595_v3, %v1235_v20  ;;  %1877 = vmin.xlane.f32.xlu1 %v1876_v19  ;;  %v1873_v22 = vsel %vm79_vm15, %v3601_v16, inf  ;;  %v1879_v26 = vsel %vm79_vm15, %v3601_v16, -inf }
 0xba4   :  { %1874 = vmin.xlane.f32.xlu0 %v1873_v22  ;;  %v3607_v23 = vmax.f32 %v1241_v18, 0.0 }
 0xba5   :  { %v3611_v25 = vmax.f32 %v1236_v21, 0.0 }
 0xba6   :  { %v2032_v27 = vsel %vm79_vm15, %v3607_v23, inf  ;;  %v2038_v39 = vsel %vm79_vm15, %v3607_v23, -inf }
 0xba7   :  { %1883 = vmax.xlane.f32.xlu1 %v1882_v24  ;;  %v2029_v28 = vsel %vm79_vm15, %v3611_v25, inf  ;;  %v2035_v38 = vsel %vm79_vm15, %v3611_v25, -inf }
 0xba8   :  { %1880 = vmax.xlane.f32.xlu0 %v1879_v26 }
 0xbab   :  { %2033 = vmin.xlane.f32.xlu1 %v2032_v27 }
 0xbac   :  { %2030 = vmin.xlane.f32.xlu0 %v2029_v28 }
 0xbaf   :  { %2039 = vmax.xlane.f32.xlu1 %v2038_v39 }
 0xbb0   :  { %2036 = vmax.xlane.f32.xlu0 %v2035_v38 }
 0xbb6   :  { %v3632_v10 = vpop.f32.mrb[20].mxu0 }
 0xbb7   :  { %v1354_v12 = vmul.f32 %v3632_v10, %v3627_v31  ;;  %v3636_v46 = vpop.f32.mrb[21].mxu0 }
 0xbb8   :  { %v1353_v32 = vmul.f32 %v3630_v47, %v3636_v46 }
 0xbb9   :  { %v1358_v33 = vsel %vm79_vm15, %v1354_v12, 0.0 }
 0xbba   :  { %v1355_v13 = vsel %vm79_vm15, %v1353_v32, 0.0 }
 0xbbb   :  { %v3642_v35 = vadd.f32 %v1358_v33, %v1355_v13 }
 0xbbe   :  { %v3644_v36 = vpop.f32.mrb[10].mxu1 }
 0xbbf   :  { %v1511_v11 = vmul.f32 %v3644_v36, %v3627_v31  ;;  %v3648_v61 = vpop.f32.mrb[11].mxu1 }
 0xbc0   :  { %v1510_v59 = vmul.f32 %v3630_v47, %v3648_v61 }
 0xbc1   :  { %v1515_v37 = vsel %vm79_vm15, %v1511_v11, 0.0 }
 0xbc2   :  { %1516 = vadd.xlane.f32.xlu1 %v1515_v37  ;;  %v1512_v40 = vsel %vm79_vm15, %v1510_v59, 0.0 }
 0xbc3   :  { %1513 = vadd.xlane.f32.xlu0 %v1512_v40  ;;  %v3654_v41 = vadd.f32 %v1515_v37, %v1512_v40 }
 0xbc6   :  { %v3656_v42 = vpop.f32.mrb[22].mxu0 }
 0xbc7   :  { %v1667_v43 = vmul.f32 %v3656_v42, %v3627_v31  ;;  %v3660_v15 = vpop.f32.mrb[23].mxu0 }
 0xbc8   :  { %v1666_v44 = vmul.f32 %v3630_v47, %v3660_v15 }
 0xbc9   :  { %v1671_v45 = vsel %vm79_vm15, %v1667_v43, 0.0 }
 0xbca   :  { %v1668_v48 = vsel %vm79_vm15, %v1666_v44, 0.0 }
 0xbcb   :  { %v3666_v34 = vadd.f32 %v1671_v45, %v1668_v48 }
 0xbce   :  { %v3668_v49 = vpop.f32.mrb[12].mxu1 }
 0xbcf   :  { %v1823_v50 = vmul.f32 %v3668_v49, %v3627_v31  ;;  %v3672_v2 = vpop.f32.mrb[13].mxu1 }
 0xbd0   :  { %v1822_v1 = vmul.f32 %v3630_v47, %v3672_v2 }
 0xbd1   :  { %v1827_v51 = vsel %vm79_vm15, %v1823_v50, 0.0 }
 0xbd2   :  { %1828 = vadd.xlane.f32.xlu1 %v1827_v51  ;;  %v1824_v52 = vsel %vm79_vm15, %v1822_v1, 0.0 }
 0xbd3   :  { %1825 = vadd.xlane.f32.xlu0 %v1824_v52  ;;  %v3678_v53 = vadd.f32 %v1827_v51, %v1824_v52 }
 0xbd6   :  { %1359 = vadd.xlane.f32.xlu1 %v1358_v33 }
 0xbd7   :  { %1356 = vadd.xlane.f32.xlu0 %v1355_v13 }
 0xbda   :  { %1672 = vadd.xlane.f32.xlu1 %v1671_v45 }
 0xbdb   :  { %1669 = vadd.xlane.f32.xlu0 %v1668_v48 }
 0xc30   :  { %v1878_v54 = vpop.xlane.xlu1 %1877 }
 0xc31   :  { %v1875_v55 = vpop.xlane.xlu0 %1874  ;;  %v1892_v18 = vsub.f32 %v3599_v9, %v1878_v54 }
 0xc32   :  { %v1891_v19 = vsub.f32 %v3601_v16, %v1875_v55 }
 0xc34   :  { %v1884_v56 = vpop.xlane.xlu1 %1883 }
 0xc35   :  { %v1886_v60 = vsub.f32 %v1884_v56, %v1878_v54  ;;  %v1881_v58 = vpop.xlane.xlu0 %1880 }
 0xc36   :  { %v1885_v62 = vsub.f32 %v1881_v58, %v1875_v55 }
 0xc37   :  { %vm1888_vm5 = vcmp.gt.f32.partialorder %v1886_v60, 0.0 }
 0xc38   :  { %v1890_v57 = vsel %vm1888_vm5, %v1886_v60, 1.0  ;;  %vm1887_vm6 = vcmp.gt.f32.partialorder %v1885_v62, 0.0  ;;  %v2034_v63 = vpop.xlane.xlu1 %2033 }
 0xc39   :  { %3112 = vrcp.f32 %v1890_v57  ;;  %v1889_v0 = vsel %vm1887_vm6, %v1885_v62, 1.0  ;;  %v2031_v5 = vpop.xlane.xlu0 %2030  ;;  %v2048_v27 = vsub.f32 %v3607_v23, %v2034_v63 }
 0xc3a   :  { %3114 = vrcp.f32 %v1889_v0  ;;  %v2047_v9 = vsub.f32 %v3611_v25, %v2031_v5 }
 0xc3c   :  { %v2040_v3 = vpop.xlane.xlu1 %2039 }
 0xc3d   :  { %v2042_v4 = vsub.f32 %v2040_v3, %v2034_v63  ;;  %v2037_v6 = vpop.xlane.xlu0 %2036 }
 0xc3e   :  { %v2041_v7 = vsub.f32 %v2037_v6, %v2031_v5 }
 0xc3f   :  { %vm2044_vm7 = vcmp.gt.f32.partialorder %v2042_v4, 0.0 }
 0xc40   :  { %v2046_v8 = vsel %vm2044_vm7, %v2042_v4, 1.0  ;;  %vm2043_vm8 = vcmp.gt.f32.partialorder %v2041_v7, 0.0 }
 0xc41   :  { %3116 = vrcp.f32 %v2046_v8  ;;  %v2045_v17 = vsel %vm2043_vm8, %v2041_v7, 1.0 }
 0xc42   :  { %3118 = vrcp.f32 %v2045_v17 }
 0xc43   :  { %v3113_v20 = vpop.eup %3112 }
 0xc44   :  { %v3115_v21 = vpop.eup %3114  ;;  %v1896_v22 = vmul.f32 %v3113_v20, %v1892_v18 }
 0xc45   :  { %v1894_v24 = vmul.f32 %v3115_v21, %v1891_v19 }
 0xc47   :  { %2881 = vmatprep.mubr.msk.f32.mxu0 %vm79_vm15, %v1894_v24  ;;  %v3001_v26 = vpack.c.bf16 %v1896_v22, %v1894_v24 }
 0xc49   :  { %3003 = vmatprep.subr.msk.bf16.mxu0 %vm3480_vm1, %v3001_v26 }
 0xc4a   :  { %3006 = vmatpush3.bf16.xpose.msk.msra.mxu0 %vm3480_vm1, %v3001_v26 }
 0xc4b   :  { %v3117_v28 = vpop.eup %3116 }
 0xc4c   :  { %v3119_v29 = vpop.eup %3118  ;;  %v2052_v30 = vmul.f32 %v3117_v28, %v2048_v27 }
 0xc4d   :  { %v2050_v16 = vmul.f32 %v3119_v29, %v2047_v9 }
 0xc4f   :  { %2888 = vmatprep.mubr.msk.f32.mxu1 %vm79_vm15, %v2050_v16  ;;  %v3007_v39 = vpack.c.bf16 %v2052_v30, %v2050_v16  ;;  %v3696_v23 = vpop.xlane.xlu1 %1516 }
 0xc50   :  { %v3698_v38 = vpop.xlane.xlu0 %1513  ;;  %v1526_v51 = vsel %vm1368_vm3, %v3696_v23, 0.0 }
 0xc51   :  { %2882 = vmatmul.mubr.msk.f32.vlgmr.msra.gmra.mrb[24].mxu0 %vm79_vm15, %v1896_v22  ;;  %3009 = vmatprep.subr.msk.bf16.mxu1 %vm3480_vm1, %v3007_v39  ;;  %v1525_v52 = vsel %vm1368_vm3, %v3698_v38, 0.0 }
 0xc52   :  { %3012 = vmatpush3.bf16.xpose.msk.msra.mxu1 %vm3480_vm1, %v3007_v39  ;;  %v1527_v63 = vadd.f32 %v1526_v51, %v1525_v52 }
 0xc59   :  { %2889 = vmatmul.mubr.msk.f32.vlgmr.msra.gmra.mrb[14].mxu1 %vm79_vm15, %v2052_v30 }
 0xc5f   :  { %v3700_v25 = vpop.xlane.xlu1 %1828 }
 0xc60   :  { %v3704_v32 = vpop.xlane.xlu0 %1825  ;;  %v1838_v0 = vsel %vm1368_vm3, %v3700_v25, 0.0 }
 0xc61   :  { %v1837_v5 = vsel %vm1368_vm3, %v3704_v32, 0.0 }
 0xc62   :  { %v1839_v7 = vadd.f32 %v1838_v0, %v1837_v5 }
 0xc63   :  { %v3716_v43 = vpop.xlane.xlu1 %1359 }
 0xc64   :  { %v3718_v44 = vpop.xlane.xlu0 %1356  ;;  %v1370_v55 = vsel %vm1368_vm3, %v3716_v43, 0.0 }
 0xc65   :  { %v1369_v56 = vsel %vm1368_vm3, %v3718_v44, 0.0 }
 0xc66   :  { %v1371_v3 = vadd.f32 %v1370_v55, %v1369_v56 }
 0xc67   :  { %v3738_v58 = vpop.xlane.xlu1 %1672 }
 0xc68   :  { %v3740_v62 = vpop.xlane.xlu0 %1669  ;;  %v1682_v4 = vsel %vm1368_vm3, %v3738_v58, 0.0 }
 0xc69   :  { %v1681_v6 = vsel %vm1368_vm3, %v3740_v62, 0.0 }
 0xc6a   :  { %v1683_v8 = vadd.f32 %v1682_v4, %v1681_v6 }
 0xd24   :  { %v3702_v12 = vpop.f32.mrb[24].mxu0 }
 0xd25   :  { %v1979_v33 = vmul.f32 %v3702_v12, %v3627_v31  ;;  %v3708_v13 = vpop.f32.mrb[25].mxu0 }
 0xd26   :  { %v1978_v11 = vmul.f32 %v3630_v47, %v3708_v13 }
 0xd27   :  { %v1983_v59 = vsel %vm79_vm15, %v1979_v33, 0.0 }
 0xd28   :  { %1984 = vadd.xlane.f32.xlu1 %v1983_v59  ;;  %v1980_v37 = vsel %vm79_vm15, %v1978_v11, 0.0 }
 0xd29   :  { %1981 = vadd.xlane.f32.xlu0 %v1980_v37  ;;  %v3714_v40 = vadd.f32 %v1983_v59, %v1980_v37 }
 0xd2c   :  { %v3720_v45 = vpop.f32.mrb[14].mxu1 }
 0xd2d   :  { %v2135_v48 = vmul.f32 %v3720_v45, %v3627_v31  ;;  %v3724_v50 = vpop.f32.mrb[15].mxu1 }
 0xd2e   :  { %v2134_v1 = vmul.f32 %v3630_v47, %v3724_v50 }
 0xd2f   :  { %v2139_v54 = vsel %vm79_vm15, %v2135_v48, 0.0 }
 0xd30   :  { %2140 = vadd.xlane.f32.xlu1 %v2139_v54  ;;  %v2136_v60 = vsel %vm79_vm15, %v2134_v1, 0.0 }
 0xd31   :  { %2137 = vadd.xlane.f32.xlu0 %v2136_v60  ;;  %v3742_v57 = vadd.f32 %v2139_v54, %v2136_v60 }
 0xd34   :  { %1528 = vadd.xlane.f32.xlu1 %v1527_v63 }
 0xd35   :  { %1372 = vadd.xlane.f32.xlu0 %v1371_v3 }
 0xd38   :  { %1840 = vadd.xlane.f32.xlu1 %v1839_v7 }
 0xd39   :  { %1684 = vadd.xlane.f32.xlu0 %v1683_v8 }
 0xdb5   :  { %v3752_v17 = vpop.xlane.xlu1 %1984 }
 0xdb6   :  { %v1994_v18 = vsel %vm1368_vm3, %v3752_v17, 0.0  ;;  %v3756_v20 = vpop.xlane.xlu0 %1981 }
 0xdb7   :  { %v1993_v19 = vsel %vm1368_vm3, %v3756_v20, 0.0 }
 0xdb8   :  { %v1995_v21 = vadd.f32 %v1994_v18, %v1993_v19 }
 0xdba   :  { %1996 = vadd.xlane.f32.xlu0 %v1995_v21 }
 0xdbd   :  { %v3760_v22 = vpop.xlane.xlu1 %2140 }
 0xdbe   :  { %v2150_v24 = vsel %vm1368_vm3, %v3760_v22, 0.0  ;;  %v3764_v26 = vpop.xlane.xlu0 %2137 }
 0xdbf   :  { %v2149_v27 = vsel %vm1368_vm3, %v3764_v26, 0.0 }
 0xdc0   :  { %v2151_v28 = vadd.f32 %v2150_v24, %v2149_v27  ;;  %v1519_v24 = vrot.slane %v3654_v41, 4  ;;  %v1362_v27 = vrot.slane %v3642_v35, 4 }
 0xdc1   :  { %v1529_v9 = vpop.xlane.xlu1 %1528 }
 0xdc2   :  { %v1530_v29 = vrot.slane %v1529_v9, 4  ;;  %2152 = vadd.xlane.f32.xlu1 %v2151_v28  ;;  %v1373_v30 = vpop.xlane.xlu0 %1372  ;;  %v1520_v28 = vadd.f32 %v1519_v24, %v3654_v41 }
 0xdc3   :  { %v1374_v16 = vrot.slane %v1373_v30, 4 }
 0xdc4   :  { %v1531_v39 = vadd.f32 %v1530_v29, %v1529_v9  ;;  %v1363_v9 = vadd.f32 %v1362_v27, %v3642_v35  ;;  %v1675_v29 = vrot.slane %v3666_v34, 4 }
 0xdc5   :  { %v1375_v33 = vadd.f32 %v1374_v16, %v1373_v30  ;;  %v1841_v11 = vpop.xlane.xlu1 %1840  ;;  %v1521_v30 = vrot.slane %v1520_v28, 2 }
 0xdc6   :  { %v1532_v59 = vrot.slane %v1531_v39, 2  ;;  %v1842_v37 = vrot.slane %v1841_v11, 4  ;;  %v1685_v48 = vpop.xlane.xlu0 %1684  ;;  %v1364_v16 = vrot.slane %v1363_v9, 2 }
 0xdc7   :  { %v1376_v1 = vrot.slane %v1375_v33, 2  ;;  %v1686_v51 = vrot.slane %v1685_v48, 4  ;;  %v1522_v41 = vadd.f32 %v1521_v30, %v1520_v28 }
 0xdc8   :  { %v1843_v52 = vadd.f32 %v1842_v37, %v1841_v11  ;;  %v1533_v54 = vadd.f32 %v1532_v59, %v1531_v39  ;;  %v1831_v39 = vrot.slane %v3678_v53, 4  ;;  %v1365_v59 = vadd.f32 %v1364_v16, %v1363_v9 }
 0xdc9   :  { %v1687_v55 = vadd.f32 %v1686_v51, %v1685_v48  ;;  %v1377_v56 = vadd.f32 %v1376_v1, %v1375_v33  ;;  %v1676_v33 = vadd.f32 %v1675_v29, %v3666_v34  ;;  %v1523_v1 = vrot.slane %v1522_v41, 1 }
 0xdca   :  { %v1844_v60 = vrot.slane %v1843_v52, 2  ;;  %v1534_v63 = vrot.slane %v1533_v54, 1  ;;  %v1832_v37 = vadd.f32 %v1831_v39, %v3678_v53  ;;  %v1366_v51 = vrot.slane %v1365_v59, 1 }
 0xdcb   :  { %v1688_v0 = vrot.slane %v1687_v55, 2  ;;  %v1378_v5 = vrot.slane %v1377_v56, 1  ;;  %v1677_v48 = vrot.slane %v1676_v33, 2 }
 0xdcc   :  { %v1535_v3 = vadd.f32 %v1534_v63, %v1533_v54  ;;  %v1845_v4 = vadd.f32 %v1844_v60, %v1843_v52  ;;  %v1833_v52 = vrot.slane %v1832_v37, 2  ;;  %v1524_v63 = vadd.f32 %v1523_v1, %v1522_v41 }
 0xdcd   :  { %v1379_v6 = vadd.f32 %v1378_v5, %v1377_v56  ;;  %v1689_v7 = vadd.f32 %v1688_v0, %v1687_v55  ;;  %v1678_v54 = vadd.f32 %v1677_v48, %v1676_v33  ;;  %v1367_v56 = vadd.f32 %v1366_v51, %v1365_v59 }
 0xdce   :  { %v1846_v8 = vrot.slane %v1845_v4, 1  ;;  %v1834_v0 = vadd.f32 %v1833_v52, %v1832_v37 }
 0xdcf   :  { %3025 = vpush %v1379_v6  ;;  %v1690_v18 = vrot.slane %v1689_v7, 1  ;;  %v1679_v5 = vrot.slane %v1678_v54, 1 }
 0xdd0   :  { %3027 = vpush %v1535_v3  ;;  %v1847_v19 = vadd.f32 %v1846_v8, %v1845_v4 }
 0xdd1   :  { %v1691_v21 = vadd.f32 %v1690_v18, %v1689_v7 }
 0xdd3   :  { %3029 = vpush %v1691_v21 }
 0xdd4   :  { %3031 = vpush %v1847_v19 }
 0xe00   :  { %s3026_s2 = spop %3025 }
 0xe01   :  { %s1383_s13 = smul.f32 0.0625, %s3026_s2  ;;  %s3028_s14 = spop %3027 }
 0xe02   :  { %s1539_s15 = smul.f32 0.0625, %s3028_s14  ;;  %s2324_s14 = sadd.f32 %s3798_s0, %s3796_s22 }
 0xe03   :  { %p1384_p5 = scmp.ne.f32.partialorder %s1383_s13, 0.0 }
 0xe04   :  { %p1540_p6 = scmp.ne.f32.partialorder %s1539_s15, 0.0  ;;  %s3030_s16 = spop %3029 }
 0xe05   :  { %s3961_s13 = smov (!%p1384_p5, %s1383_s13), 1.0  ;;  %s1695_s17 = smul.f32 0.0625, %s3030_s16 }
 0xe06   :  { %s3963_s15 = smov (!%p1540_p6, %s1539_s15), 1.0  ;;  %v1386_v11 = vstv %s3961_s13  ;;  %s3032_s18 = spop %3031 }
 0xe07   :  { %3120 = vrcp.f32 %v1386_v11  ;;  %v1542_v35 = vstv %s3963_s15  ;;  %s1851_s19 = smul.f32 0.0625, %s3032_s18  ;;  %p1696_p7 = scmp.ne.f32.partialorder %s1695_s17, 0.0 }
 0xe08   :  { %3122 = vrcp.f32 %v1542_v35  ;;  %s2236_s13 = sadd.f32 %s3794_s21, %s3792_s20 }
 0xe09   :  { %p1852_p8 = scmp.ne.f32.partialorder %s1851_s19, 0.0  ;;  %s3965_s17 = smov (!%p1696_p7, %s1695_s17), 1.0 }
 0xe0a   :  { %v1698_v34 = vstv %s3965_s17  ;;  %s2237_s15 = sadd.f32 %s3824_s4, %s2236_s13 }
 0xe0b   :  { %s3967_s19 = smov (!%p1852_p8, %s1851_s19), 1.0  ;;  %3124 = vrcp.f32 %v1698_v34  ;;  %s2325_s16 = sadd.f32 %s3835_s7, %s2324_s14 }
 0xe0c   :  { %v1854_v55 = vstv %s3967_s19 }
 0xe0d   :  { %3126 = vrcp.f32 %v1854_v55 }
 0xe11   :  { %v3121_v60 = vpop.eup %3120 }
 0xe12   :  { %v3123_v3 = vpop.eup %3122  ;;  %v1388_v53 = vmul.f32 %v3121_v60, %v3718_v44  ;;  %v1389_v4 = vmul.f32 %v3121_v60, %v3716_v43  ;;  %v1390_v6 = vmul.f32 %v3121_v60, %v1367_v56  ;;  %v1393_v7 = vmul.f32 %v3121_v60, %v3636_v46 }
 0xe13   :  { %v1394_v8 = vmul.f32 %v3121_v60, %v3632_v10  ;;  %v1544_v18 = vmul.f32 %v3123_v3, %v3698_v38  ;;  %v1545_v19 = vmul.f32 %v3123_v3, %v3696_v23  ;;  %v1546_v21 = vmul.f32 %v3123_v3, %v1524_v63 }
 0xe14   :  { %v1391_v24 = vadd.f32 %v1390_v6, %v1388_v53  ;;  %v1392_v27 = vadd.f32 %v1390_v6, %v1389_v4  ;;  %v1395_v28 = vmul.f32 2.0, %v1393_v7  ;;  %v1549_v9 = vmul.f32 %v3123_v3, %v3648_v61 }
 0xe15   :  { %v1396_v29 = vmul.f32 2.0, %v1394_v8  ;;  %v1547_v30 = vadd.f32 %v1546_v21, %v1544_v18  ;;  %v1550_v44 = vmul.f32 %v3123_v3, %v3644_v36  ;;  %v1680_v43 = vadd.f32 %v1679_v5, %v1678_v54  ;;  %v3125_v33 = vpop.eup %3124 }
 0xe16   :  { %v1397_v16 = vsub.f32 %v1391_v24, %v1395_v28  ;;  %v1548_v39 = vadd.f32 %v1546_v21, %v1545_v19  ;;  %v1551_v46 = vmul.f32 2.0, %v1549_v9  ;;  %v1835_v10 = vrot.slane %v1834_v0, 1 }
 0xe17   :  { %v1398_v11 = vsub.f32 %v1392_v27, %v1396_v29  ;;  %v1552_v38 = vmul.f32 2.0, %v1550_v44  ;;  %v1700_v23 = vmul.f32 %v3125_v33, %v3740_v62  ;;  %v1701_v41 = vmul.f32 %v3125_v33, %v3738_v58  ;;  %v3127_v37 = vpop.eup %3126 }
 0xe18   :  { %v1399_v35 = vmul.f32 -0.5, %v1397_v16  ;;  %v1702_v59 = vmul.f32 %v3125_v33, %v1680_v43  ;;  %v1705_v48 = vmul.f32 %v3125_v33, %v3660_v15  ;;  %v1706_v36 = vmul.f32 %v3125_v33, %v3656_v42 }
 0xe19   :  { %v1400_v61 = vmul.f32 -0.5, %v1398_v11  ;;  %v1553_v1 = vsub.f32 %v1547_v30, %v1551_v46  ;;  %v1554_v52 = vsub.f32 %v1548_v39, %v1552_v38  ;;  %v1836_v56 = vadd.f32 %v1835_v10, %v1834_v0 }
 0xe1a   :  { %v1703_v51 = vadd.f32 %v1702_v59, %v1700_v23  ;;  %v1704_v34 = vadd.f32 %v1702_v59, %v1701_v41  ;;  %v1707_v54 = vmul.f32 2.0, %v1705_v48  ;;  %v1708_v55 = vmul.f32 2.0, %v1706_v36 }
 0xe1b   :  { %v1856_v60 = vmul.f32 %v3127_v37, %v3704_v32  ;;  %v1857_v62 = vmul.f32 %v3127_v37, %v3700_v25  ;;  %v1401_v63 = vmul.f32 1.442695, %v1399_v35  ;;  %v1403_v58 = vmul.f32 1.442695, %v1400_v61 }
 0xe1c   :  { %v1709_v5 = vsub.f32 %v1703_v51, %v1707_v54  ;;  %v1710_v3 = vsub.f32 %v1704_v34, %v1708_v55  ;;  %v1555_v53 = vmul.f32 -0.5, %v1553_v1  ;;  %v1858_v4 = vmul.f32 %v3127_v37, %v1836_v56 }
 0xe1d   :  { %v1861_v15 = vmul.f32 %v3127_v37, %v3672_v2  ;;  %v1862_v42 = vmul.f32 %v3127_v37, %v3668_v49  ;;  %v1556_v8 = vmul.f32 -0.5, %v1554_v52  ;;  %3128 = vpow2.f32 %v1401_v63 }
 0xe1e   :  { %v1711_v6 = vmul.f32 -0.5, %v1709_v5  ;;  %v1712_v7 = vmul.f32 -0.5, %v1710_v3  ;;  %v1859_v18 = vadd.f32 %v1858_v4, %v1856_v60  ;;  %v1860_v19 = vadd.f32 %v1858_v4, %v1857_v62 }
 0xe1f   :  { %v1863_v0 = vmul.f32 2.0, %v1861_v15  ;;  %v1864_v25 = vmul.f32 2.0, %v1862_v42  ;;  %3130 = vpow2.f32 %v1403_v58  ;;  %v1557_v24 = vmul.f32 1.442695, %v1555_v53 }
 0xe20   :  { %v1713_v32 = vmul.f32 1.442695, %v1711_v6  ;;  %v1715_v21 = vmul.f32 1.442695, %v1712_v7  ;;  %v1559_v49 = vmul.f32 1.442695, %v1556_v8  ;;  %v2193_v43 = vstv %s3792_s20 }
 0xe21   :  { %v1865_v27 = vsub.f32 %v1859_v18, %v1863_v0  ;;  %v1866_v2 = vsub.f32 %v1860_v19, %v1864_v25  ;;  %v2196_v16 = vstv %s3794_s21  ;;  %v2281_v59 = vstv %s3796_s22 }
 0xe22   :  { %3132 = vpow2.f32 %v1713_v32  ;;  %v2284_v37 = vstv %s3798_s0  ;;  %v1987_v19 = vrot.slane %v3714_v40, 4 }
 0xe23   :  { %3134 = vpow2.f32 %v1715_v21  ;;  %v1867_v28 = vmul.f32 -0.5, %v1865_v27  ;;  %v1868_v9 = vmul.f32 -0.5, %v1866_v2  ;;  %v2143_v21 = vrot.slane %v3742_v57, 4 }
 0xe24   :  { %3136 = vpow2.f32 %v1557_v24  ;;  %v1988_v0 = vadd.f32 %v1987_v19, %v3714_v40 }
 0xe25   :  { %v1869_v29 = vmul.f32 1.442695, %v1867_v28  ;;  %3138 = vpow2.f32 %v1559_v49  ;;  %v1871_v30 = vmul.f32 1.442695, %v1868_v9  ;;  %v2144_v27 = vadd.f32 %v2143_v21, %v3742_v57 }
 0xe26   :  { %v1989_v32 = vrot.slane %v1988_v0, 2 }
 0xe27   :  { %3140 = vpow2.f32 %v1869_v29  ;;  %v3129_v44 = vpop.eup %3128  ;;  %v2145_v2 = vrot.slane %v2144_v27, 2 }
 0xe28   :  { %3142 = vpow2.f32 %v1871_v30  ;;  %v2194_v10 = vmul.f32 %v3129_v44, %v2193_v43  ;;  %v1990_v24 = vadd.f32 %v1989_v32, %v1988_v0 }
 0xe29   :  { %v3131_v39 = vpop.eup %3130  ;;  %v2146_v9 = vadd.f32 %v2145_v2, %v2144_v27  ;;  %v3847_v27 = vstv %s2630_s8  ;;  %v59_v2 = vld [vmem:[%s3953_s3 + $0x18] sm:$0xff] }
 0xe2a   :  { %v2195_v38 = vmul.f32 %v3131_v39, %v2193_v43  ;;  %v1991_v49 = vrot.slane %v1990_v24, 1 }
 0xe2b   :  { %v2147_v57 = vrot.slane %v2146_v9, 1 }
 0xe2c   :  { %v3133_v46 = vpop.eup %3132  ;;  %v1992_v40 = vadd.f32 %v1991_v49, %v1990_v24  ;;  %v2289_v24 = vstv %s3835_s7 }
 0xe2d   :  { %v3135_v33 = vpop.eup %3134  ;;  %v2197_v11 = vmul.f32 %v3133_v46, %v2196_v16 }
 0xe2e   :  { %v2198_v35 = vmul.f32 %v3135_v33, %v2196_v16  ;;  %v3137_v23 = vpop.eup %3136 }
 0xe2f   :  { %v3802_v41 = vadd.f32 %v2197_v11, %v2194_v10  ;;  %v3139_v61 = vpop.eup %3138  ;;  %v2282_v51 = vmul.f32 %v3137_v23, %v2281_v59  ;;  %v2148_v23 = vadd.f32 %v2147_v57, %v2146_v9 }
 0xe30   :  { %v3806_v48 = vadd.f32 %v2198_v35, %v2195_v38  ;;  %v2283_v52 = vmul.f32 %v3139_v61, %v2281_v59 }
 0xe31   :  { %v3141_v36 = vpop.eup %3140 }
 0xe32   :  { %v3143_v1 = vpop.eup %3142  ;;  %v2285_v34 = vmul.f32 %v3141_v36, %v2284_v37 }
 0xe33   :  { %v2286_v54 = vmul.f32 %v3143_v1, %v2284_v37 }
 0xe34   :  { %v3808_v55 = vadd.f32 %v2285_v34, %v2282_v51 }
 0xe35   :  { %v3810_v56 = vadd.f32 %v2286_v54, %v2283_v52 }
 0xe47   :  { %v1997_v60 = vpop.xlane.xlu0 %1996 }
 0xe48   :  { %v1998_v62 = vrot.slane %v1997_v60, 4 }
 0xe4a   :  { %v1999_v63 = vadd.f32 %v1998_v62, %v1997_v60 }
 0xe4c   :  { %v2000_v58 = vrot.slane %v1999_v63, 2 }
 0xe4e   :  { %v2001_v5 = vadd.f32 %v2000_v58, %v1999_v63 }
 0xe4f   :  { %v2153_v3 = vpop.xlane.xlu1 %2152 }
 0xe50   :  { %v2154_v53 = vrot.slane %v2153_v3, 4  ;;  %v2002_v4 = vrot.slane %v2001_v5, 1 }
 0xe52   :  { %v2155_v15 = vadd.f32 %v2154_v53, %v2153_v3  ;;  %v2003_v42 = vadd.f32 %v2002_v4, %v2001_v5  ;;  %v3830_v3 = vstv %s2626_s27  ;;  %v57_v53 = vld [vmem:[%s3953_s3 + $0x8] sm:$0xff] }
 0xe54   :  { %v2156_v6 = vrot.slane %v2155_v15, 2  ;;  %3033 = vpush %v2003_v42 }
 0xe56   :  { %v2157_v7 = vadd.f32 %v2156_v6, %v2155_v15 }
 0xe58   :  { %v2158_v8 = vrot.slane %v2157_v7, 1 }
 0xe5a   :  { %v2159_v18 = vadd.f32 %v2158_v8, %v2157_v7  ;;  %v2208_v8 = vmul.f32 %v3830_v3, %v57_v53 }
 0xe5c   :  { %3035 = vpush %v2159_v18 }
 0xe85   :  { %s3034_s23 = spop %3033 }
 0xe86   :  { %s2007_s24 = smul.f32 0.0625, %s3034_s23 }
 0xe88   :  { %p2008_p9 = scmp.ne.f32.partialorder %s2007_s24, 0.0 }
 0xe8a   :  { %s3969_s24 = smov (!%p2008_p9, %s2007_s24), 1.0 }
 0xe8b   :  { %v2010_v25 = vstv %s3969_s24 }
 0xe8c   :  { %3144 = vrcp.f32 %v2010_v25  ;;  %v58_v25 = vld [vmem:[%s3953_s3 + $0x10] sm:$0xff] }
 0xe8d   :  { %s3036_s25 = spop %3035  ;;  %v2295_v9 = vmul.f32 %v3847_v27, %v58_v25  ;;  %v77_v57 = vmul.f32 %v3630_v47, %v58_v25 }
 0xe8e   :  { %s2163_s26 = smul.f32 0.0625, %s3036_s25 }
 0xe90   :  { %p2164_p10 = scmp.ne.f32.partialorder %s2163_s26, 0.0 }
 0xe92   :  { %s3971_s26 = smov (!%p2164_p10, %s2163_s26), 1.0 }
 0xe93   :  { %v2166_v28 = vstv %s3971_s26 }
 0xe94   :  { %3146 = vrcp.f32 %v2166_v28 }
 0xe96   :  { %v3145_v29 = vpop.eup %3144 }
 0xe97   :  { %v2012_v30 = vmul.f32 %v3145_v29, %v3756_v20  ;;  %v2013_v44 = vmul.f32 %v3145_v29, %v3752_v17  ;;  %v2014_v43 = vmul.f32 %v3145_v29, %v1992_v40  ;;  %v2017_v16 = vmul.f32 %v3145_v29, %v3708_v13 }
 0xe98   :  { %v2018_v39 = vmul.f32 %v3145_v29, %v3702_v12 }
 0xe99   :  { %v2015_v46 = vadd.f32 %v2014_v43, %v2012_v30  ;;  %v2016_v33 = vadd.f32 %v2014_v43, %v2013_v44  ;;  %v2019_v10 = vmul.f32 2.0, %v2017_v16  ;;  %v2296_v43 = vmul.f32 %v3847_v27, %v59_v2 }
 0xe9a   :  { %v2020_v11 = vmul.f32 2.0, %v2018_v39 }
 0xe9b   :  { %v2021_v38 = vsub.f32 %v2015_v46, %v2019_v10 }
 0xe9c   :  { %v2022_v35 = vsub.f32 %v2016_v33, %v2020_v11 }
 0xe9d   :  { %v2023_v59 = vmul.f32 -0.5, %v2021_v38 }
 0xe9e   :  { %v3147_v37 = vpop.eup %3146  ;;  %v2024_v61 = vmul.f32 -0.5, %v2022_v35  ;;  %v93_v35 = vsel %vm79_vm15, %v77_v57, 0.0 }
 0xe9f   :  { %v2025_v36 = vmul.f32 1.442695, %v2023_v59  ;;  %v2168_v20 = vmul.f32 %v3147_v37, %v3764_v26  ;;  %v2169_v17 = vmul.f32 %v3147_v37, %v3760_v22  ;;  %v2170_v1 = vmul.f32 %v3147_v37, %v2148_v23 }
 0xea0   :  { %v2027_v13 = vmul.f32 1.442695, %v2024_v61  ;;  %v2173_v12 = vmul.f32 %v3147_v37, %v3724_v50  ;;  %v2174_v51 = vmul.f32 %v3147_v37, %v3720_v45  ;;  %v56_v45 = vld [vmem:[%s3953_s3] sm:$0xff]  ;;  %v2201_v50 = vstv %s3824_s4 }
 0xea1   :  { %3148 = vpow2.f32 %v2025_v36  ;;  %v2171_v34 = vadd.f32 %v2170_v1, %v2168_v20  ;;  %v2172_v52 = vadd.f32 %v2170_v1, %v2169_v17  ;;  %v2207_v6 = vmul.f32 %v3830_v3, %v56_v45 }
 0xea2   :  { %3150 = vpow2.f32 %v2027_v13  ;;  %v2175_v54 = vmul.f32 2.0, %v2173_v12  ;;  %v2176_v60 = vmul.f32 2.0, %v2174_v51  ;;  %v75_v23 = vmul.f32 %v3630_v47, %v56_v45  ;;  %v62_v12 = vld [vmem:[%s3953_s3 + $0x30] sm:$0xff] }
 0xea3   :  { %v78_v20 = vmul.f32 %v3627_v31, %v59_v2  ;;  %v76_v1 = vmul.f32 %v3627_v31, %v57_v53  ;;  %2895 = vmatprep.mubr.msk.f32.mxu0 %vm79_vm15, %v62_v12 }
 0xea4   :  { %v2177_v62 = vsub.f32 %v2171_v34, %v2175_v54  ;;  %v2178_v26 = vsub.f32 %v2172_v52, %v2176_v60  ;;  %v80_v61 = vsel %vm79_vm15, %v75_v23, 0.0 }
 0xea5   :  { %v96_v17 = vsel %vm79_vm15, %v78_v20, 0.0  ;;  %v83_v13 = vsel %vm79_vm15, %v76_v1, 0.0 }
 0xea6   :  { %v2179_v63 = vmul.f32 -0.5, %v2177_v62  ;;  %v2180_v22 = vmul.f32 -0.5, %v2178_v26  ;;  %v86_v53 = vadd.f32 %v83_v13, %v80_v61 }
 0xea8   :  { %v2181_v58 = vmul.f32 1.442695, %v2179_v63  ;;  %v2183_v5 = vmul.f32 1.442695, %v2180_v22 }
 0xeaa   :  { %3152 = vpow2.f32 %v2181_v58 }
 0xeab   :  { %v3149_v4 = vpop.eup %3148  ;;  %3154 = vpow2.f32 %v2183_v5 }
 0xeac   :  { %v3151_v15 = vpop.eup %3150  ;;  %v2202_v42 = vmul.f32 %v3149_v4, %v2201_v50  ;;  %v99_v4 = vadd.f32 %v96_v17, %v93_v35 }
 0xead   :  { %v2203_v7 = vmul.f32 %v3151_v15, %v2201_v50  ;;  %v87_v15 = vrot.slane %v86_v53, 4 }
 0xeae   :  { %v2204_v18 = vadd.f32 %v2202_v42, %v3802_v41  ;;  %v100_v42 = vrot.slane %v99_v4, 4 }
 0xeaf   :  { %v2205_v19 = vadd.f32 %v2203_v7, %v3806_v48 }
 0xeb0   :  { %v2209_v0 = vadd.f32 %v2207_v6, %v2204_v18  ;;  %v88_v6 = vadd.f32 %v87_v15, %v86_v53  ;;  %v101_v7 = vadd.f32 %v100_v42, %v99_v4 }
 0xeb1   :  { %v2210_v32 = vadd.f32 %v2208_v8, %v2205_v19 }
 0xeb2   :  { %v3841_v21 = vand.u32 2147483647, %v2209_v0  ;;  %v89_v8 = vrot.slane %v88_v6, 2  ;;  %v102_v18 = vrot.slane %v101_v7, 2 }
 0xeb3   :  { %v3849_v49 = vand.u32 2147483647, %v2210_v32 }
 0xeb4   :  { %v3153_v41 = vpop.eup %3152  ;;  %vm2213_vm4 = vcmp.ne.f32.partialorder %v3841_v21, 0.0  ;;  %v90_v19 = vadd.f32 %v89_v8, %v88_v6  ;;  %v103_v32 = vadd.f32 %v102_v18, %v101_v7 }
 0xeb5   :  { %v3155_v48 = vpop.eup %3154  ;;  %vm2214_vm9 = vcmp.ne.f32.partialorder %v3849_v49, 0.0  ;;  %v2215_v28 = vsel %vm2213_vm4, %v3841_v21, inf  ;;  %v2290_v40 = vmul.f32 %v3153_v41, %v2289_v24 }
 0xeb6   :  { %v2216_v29 = vsel %vm2214_vm9, %v3849_v49, inf  ;;  %v2217_v30 = vsel %vm79_vm15, %v2215_v28, inf  ;;  %v2291_v44 = vmul.f32 %v3155_v48, %v2289_v24  ;;  %v91_v25 = vrot.slane %v90_v19, 1 }
 0xeb7   :  { %v2218_v16 = vsel %vm79_vm15, %v2216_v29, inf  ;;  %v2292_v39 = vadd.f32 %v2290_v40, %v3808_v55  ;;  %v104_v24 = vrot.slane %v103_v32, 1  ;;  %v2240_v40 = vstv %s2237_s15 }
 0xeb8   :  { %v2219_v46 = vmin.f32 %v2217_v30, %v2218_v16  ;;  %v2293_v33 = vadd.f32 %v2291_v44, %v3810_v56  ;;  %v92_v2 = vadd.f32 %v91_v25, %v90_v19  ;;  %v2328_v16 = vstv %s2325_s16 }
 0xeb9   :  { %v2297_v10 = vadd.f32 %v2295_v9, %v2292_v39  ;;  %v105_v28 = vadd.f32 %v104_v24, %v103_v32 }
 0xeba   :  { %2220 = vmin.xlane.f32.xlu0 %v2219_v46  ;;  %v2298_v11 = vadd.f32 %v2296_v43, %v2293_v33  ;;  %v2245_v9 = vmul.f32 %v3830_v3, %v92_v2 }
 0xebb   :  { %v3865_v38 = vand.u32 2147483647, %v2297_v10  ;;  %v2333_v39 = vmul.f32 %v3847_v27, %v105_v28 }
 0xebc   :  { %v3869_v59 = vand.u32 2147483647, %v2298_v11  ;;  %v2246_v57 = vadd.f32 %v2245_v9, %v2240_v40 }
 0xebd   :  { %vm2301_vm10 = vcmp.ne.f32.partialorder %v3865_v38, 0.0 }
 0xebe   :  { %vm2302_vm11 = vcmp.ne.f32.partialorder %v3869_v59, 0.0  ;;  %v2303_v55 = vsel %vm2301_vm10, %v3865_v38, inf  ;;  %94 = vadd.xlane.f32.xlu0 %v93_v35  ;;  %v2334_v35 = vadd.f32 %v2333_v39, %v2328_v16  ;;  %v2247_v23 = vand.u32 2147483647, %v2246_v57  ;;  %v60_v57 = vld [vmem:[%s3953_s3 + $0x20] sm:$0xff] }
 0xebf   :  { %v2304_v56 = vsel %vm2302_vm11, %v3869_v59, inf  ;;  %v2305_v37 = vsel %vm79_vm15, %v2303_v55, inf }
 0xec0   :  { %v2306_v36 = vsel %vm79_vm15, %v2304_v56, inf  ;;  %vm2252_vm13 = vcmp.eq.f32.partialorder %v2247_v23, 0.0 }
 0xec1   :  { %v2307_v47 = vmin.f32 %v2305_v37, %v2306_v36  ;;  %v2335_v36 = vand.u32 2147483647, %v2334_v35 }
 0xec2   :  { %81 = vadd.xlane.f32.xlu0 %v80_v61 }
 0xec3   :  { %2308 = vmin.xlane.f32.xlu1 %v2307_v47  ;;  %vm2340_vm2 = vcmp.eq.f32.partialorder %v2335_v36, 0.0 }
 0xec7   :  { %97 = vadd.xlane.f32.xlu1 %v96_v17 }
 0xecb   :  { %84 = vadd.xlane.f32.xlu1 %v83_v13 }
 0xf47   :  { %v2221_v51 = vpop.xlane.xlu0 %2220 }
 0xf48   :  { %v2222_v34 = vrot.slane %v2221_v51, 4 }
 0xf4a   :  { %v2223_v52 = vmin.f32 %v2221_v51, %v2222_v34 }
 0xf4b   :  { %v95_v0 = vpop.xlane.xlu0 %94 }
 0xf4c   :  { %v2224_v54 = vrot.slane %v2223_v52, 2  ;;  %v2326_v44 = vmul.f32 %v3847_v27, %v95_v0 }
 0xf4e   :  { %v2225_v60 = vmin.f32 %v2223_v52, %v2224_v54  ;;  %v2329_v33 = vadd.f32 %v2328_v16, %v2326_v44 }
 0xf4f   :  { %v82_v41 = vpop.xlane.xlu0 %81 }
 0xf50   :  { %v2309_v62 = vpop.xlane.xlu1 %2308  ;;  %v2226_v26 = vrot.slane %v2225_v60, 1  ;;  %v2238_v48 = vmul.f32 %v3830_v3, %v82_v41  ;;  %v2331_v37 = vand.u32 2147483647, %v2329_v33 }
 0xf51   :  { %v2310_v63 = vrot.slane %v2309_v62, 4 }
 0xf52   :  { %v2227_v22 = vmin.f32 %v2225_v60, %v2226_v26  ;;  %v2241_v43 = vadd.f32 %v2240_v40, %v2238_v48  ;;  %vm2336_vm0 = vcmp.eq.f32.partialorder %v2331_v37, 0.0 }
 0xf53   :  { %v2311_v31 = vmin.f32 %v2309_v62, %v2310_v63 }
 0xf54   :  { %3037 = vpush %v2227_v22  ;;  %v98_v29 = vpop.xlane.xlu1 %97  ;;  %v2243_v11 = vand.u32 2147483647, %v2241_v43 }
 0xf55   :  { %v2312_v58 = vrot.slane %v2311_v31, 2  ;;  %v2327_v30 = vmul.f32 %v3847_v27, %v98_v29 }
 0xf56   :  { %vm2248_vm12 = vcmp.eq.f32.partialorder %v2243_v11, 0.0 }
 0xf57   :  { %v2313_v5 = vmin.f32 %v2311_v31, %v2312_v58  ;;  %v2330_v46 = vadd.f32 %v2328_v16, %v2327_v30 }
 0xf58   :  { %v85_v10 = vpop.xlane.xlu1 %84 }
 0xf59   :  { %v2314_v45 = vrot.slane %v2313_v5, 1  ;;  %v2239_v55 = vmul.f32 %v3830_v3, %v85_v10  ;;  %v2332_v56 = vand.u32 2147483647, %v2330_v46  ;;  %v61_v46 = vld [vmem:[%s3953_s3 + $0x28] sm:$0xff] }
 0xf5a   :  { %v3019_v35 = vpack.c.bf16 %v61_v46, %v60_v57 }
 0xf5b   :  { %v2315_v50 = vmin.f32 %v2313_v5, %v2314_v45  ;;  %v2242_v27 = vadd.f32 %v2240_v40, %v2239_v55  ;;  %vm2337_vm14 = vcmp.eq.f32.partialorder %v2332_v56, 0.0 }
 0xf5d   :  { %3039 = vpush %v2315_v50  ;;  %v2244_v17 = vand.u32 2147483647, %v2242_v27 }
 0xf5f   :  { %vm2249_vm5 = vcmp.eq.f32.partialorder %v2244_v17, 0.0 }
 0xf85   :  { %s3038_s17 = spop %3037 }
 0xf86   :  { %p2229_p11 = scmp.lt.f32.partialorder %s3038_s17, 3e+38 }
 0xf88   :  { %s3973_s17 = smov (!%p2229_p11, %s3038_s17), 1.0 }
 0xf89   :  { %v3898_v61 = vstv %s3973_s17 }
 0xf8a   :  { %v2250_v20 = vsel %vm2248_vm12, %v3898_v61, %v2243_v11  ;;  %v2253_v47 = vsel %vm2252_vm13, %v3898_v61, %v2247_v23  ;;  %v2251_v51 = vsel %vm2249_vm5, %v3898_v61, %v2244_v17  ;;  %vm2320_vm5 = vcmp.eq.f32.partialorder %v3869_v59, 0.0 }
 0xf8b   :  { %3156 = vrsqrt.f32 %v2250_v20  ;;  %vm2256_vm10 = vcmp.eq.f32.partialorder %v2250_v20, inf  ;;  %vm2270_vm11 = vcmp.eq.f32.partialorder %v2253_v47, inf  ;;  %v2259_v25 = vand.u32 2147483648, %v2250_v20 }
 0xf8c   :  { %3158 = vrsqrt.f32 %v2253_v47  ;;  %v2273_v24 = vand.u32 2147483648, %v2253_v47  ;;  %vm2258_vm12 = vcmp.eq.f32.partialorder %v2250_v20, 0.0  ;;  %vm2272_vm13 = vcmp.eq.f32.partialorder %v2253_v47, 0.0 }
 0xf8d   :  { %v2266_v9 = vand.u32 2147483648, %v2251_v51 }
 0xf8e   :  { %s3040_s18 = spop %3039 }
 0xf8f   :  { %p2317_p12 = scmp.lt.f32.partialorder %s3040_s18, 3e+38 }
 0xf91   :  { %s3975_s18 = smov (!%p2317_p12, %s3040_s18), 1.0 }
 0xf92   :  { %v3902_v3 = vstv %s3975_s18 }
 0xf93   :  { %v2338_v1 = vsel %vm2336_vm0, %v3902_v3, %v2331_v37  ;;  %v2339_v13 = vsel %vm2337_vm14, %v3902_v3, %v2332_v56  ;;  %v2341_v12 = vsel %vm2340_vm2, %v3902_v3, %v2335_v36  ;;  %vm2263_vm14 = vcmp.eq.f32.partialorder %v2251_v51, inf }
 0xf94   :  { %3160 = vrsqrt.f32 %v2338_v1  ;;  %vm2344_vm6 = vcmp.eq.f32.partialorder %v2338_v1, inf  ;;  %vm2346_vm7 = vcmp.eq.f32.partialorder %v2338_v1, 0.0  ;;  %v2347_v63 = vand.u32 2147483648, %v2338_v1 }
 0xf95   :  { %3162 = vrsqrt.f32 %v2339_v13  ;;  %v3157_v34 = vpop.eup %3156  ;;  %vm2351_vm8 = vcmp.eq.f32.partialorder %v2339_v13, inf  ;;  %vm2353_vm3 = vcmp.eq.f32.partialorder %v2339_v13, 0.0  ;;  %v2354_v5 = vand.u32 2147483648, %v2339_v13 }
 0xf96   :  { %3164 = vrsqrt.f32 %v2341_v12  ;;  %v3159_v52 = vpop.eup %3158  ;;  %v2255_v31 = vmul.f32 %v3157_v34, %v2250_v20  ;;  %vm2358_vm4 = vcmp.eq.f32.partialorder %v2341_v12, inf  ;;  %v2361_v4 = vand.u32 2147483648, %v2341_v12 }
 0xf97   :  { %3166 = vrsqrt.f32 %v2251_v51  ;;  %v2269_v15 = vmul.f32 %v3159_v52, %v2253_v47  ;;  %vm2360_vm9 = vcmp.eq.f32.partialorder %v2341_v12, 0.0  ;;  %vm2265_vm0 = vcmp.eq.f32.partialorder %v2251_v51, 0.0 }
 0xf98   :  { %v2257_v0 = vsel %vm2256_vm10, %v2250_v20, %v2255_v31  ;;  %vm2319_vm2 = vcmp.eq.f32.partialorder %v3865_v38, 0.0  ;;  %v2323_v16 = vsel %vm2320_vm5, %v3902_v3, %v3869_v59  ;;  %v63_v59 = vld [vmem:[%s3953_s3 + $0x38] sm:$0xff]  ;;  %s3218_s3 = smov [#allocation5]  }
 0xf99   :  { %v2271_v32 = vsel %vm2270_vm11, %v2253_v47, %v2269_v15  ;;  %v2260_v2 = vsel %vm2258_vm12, %v2259_v25, %v2257_v0  ;;  %v2322_v44 = vsel %vm2319_vm2, %v3902_v3, %v3865_v38  ;;  %s2546_s24 = sshll.u32 %s3218_s3, 4  ;;  %s2547_s24 = int_to_ptr.vmem [resolvable:$true] %s2546_s24 }
 0xf9a   :  { %v2274_v48 = vsel %vm2272_vm13, %v2273_v24, %v2271_v32  ;;  %s3188_s25 = scalar_lea.vmem %s2547_s24, 256  ;;  %p3193_p0 = scmp.lt.s32.totalorder %s2547_s24, %s2547_s24 }
 0xf9b   :  { %v2275_v28 = vmul.f32 %v2274_v48, %v2260_v2  ;;  %p3189_p13 = scmp.ne.s32.totalorder %s2547_s24, %s3188_s25  ;;  %p3194_p1 = scmp.lt.s32.totalorder %s3188_s25, %s3188_s25 }
 0xf9d   :  { %p3195_p2 = por %p3194_p1, %p3193_p0 }
 0xf9e   :  { %v3161_v54 = vpop.eup %3160 }
 0xf9f   :  { %v3163_v60 = vpop.eup %3162  ;;  %v2343_v62 = vmul.f32 %v3161_v54, %v2338_v1  ;;  %p3196_p3 = pnand %p3195_p2, %p3189_p13 }
 0xfa0   :  { %v3165_v26 = vpop.eup %3164  ;;  %v2350_v22 = vmul.f32 %v3163_v60, %v2339_v13 }
 0xfa1   :  { %v2345_v58 = vsel %vm2344_vm6, %v2338_v1, %v2343_v62  ;;  %v2357_v45 = vmul.f32 %v3165_v26, %v2341_v12  ;;  %v3167_v19 = vpop.eup %3166  ;;  %vm2231_vm6 = vcmp.eq.f32.partialorder %v3841_v21, 0.0 }
 0xfa2   :  { %v2348_v50 = vsel %vm2346_vm7, %v2347_v63, %v2345_v58  ;;  %v2352_v53 = vsel %vm2351_vm8, %v2339_v13, %v2350_v22  ;;  %v2262_v41 = vmul.f32 %v3167_v19, %v2251_v51  ;;  %v2234_v23 = vsel %vm2231_vm6, %v3898_v61, %v3841_v21 }
 0xfa3   :  { %v2355_v42 = vsel %vm2353_vm3, %v2354_v5, %v2352_v53  ;;  %v2359_v6 = vsel %vm2358_vm4, %v2341_v12, %v2357_v45 }
 0xfa4   :  { %v2362_v7 = vsel %vm2360_vm9, %v2361_v4, %v2359_v6  ;;  %v2264_v40 = vsel %vm2263_vm14, %v2251_v51, %v2262_v41 }
 0xfa5   :  { %v2363_v8 = vmul.f32 %v2362_v7, %v2348_v50  ;;  %v2364_v18 = vmul.f32 %v2362_v7, %v2355_v42  ;;  %v2267_v30 = vsel %vm2265_vm0, %v2266_v9, %v2264_v40 }
 0xfa6   :  { %v2276_v10 = vmul.f32 %v2274_v48, %v2267_v30 }
 0xfa7   :  { %3168 = vrcp.f32 %v2363_v8 }
 0xfa8   :  { %3170 = vrcp.f32 %v2364_v18 }
 0xfa9   :  { %3172 = vrcp.f32 %v2275_v28 }
 0xfaa   :  { %3174 = vrcp.f32 %v2276_v10 }
 0xfb1   :  { %v3169_v29 = vpop.eup %3168 }
 0xfb2   :  { %v3171_v43 = vpop.eup %3170  ;;  %v2366_v39 = vmul.f32 %v3169_v29, %v2322_v44 }
 0xfb3   :  { %v2368_v33 = vmul.f32 %v3171_v43, %v2323_v16  ;;  %v3173_v38 = vpop.eup %3172 }
 0xfb4   :  { %v2278_v55 = vmul.f32 %v3173_v38, %v2234_v23  ;;  %v3175_v56 = vpop.eup %3174 }
 0xfb5   :  { %v3013_v11 = vpack.c.bf16 %v2368_v33, %v2366_v39 }
 0xfb7   :  { %3015 = vmatprep.subr.msk.bf16.mxu0 %vm3480_vm1, %v3013_v11 }
 0xfb8   :  { %3018 = vmatpush3.bf16.xpose.msk.msra.mxu0 %vm3480_vm1, %v3013_v11  ;;  %vm2232_vm1 = vcmp.eq.f32.partialorder %v3849_v49, 0.0 }
 0xfb9   :  { %3020 = vmatprep.subr.bf16.mxu0 %v3019_v35  ;;  %v2235_v14 = vsel %vm2232_vm1, %v3898_v61, %v3849_v49 }
 0xfba   :  { %v2280_v37 = vmul.f32 %v3175_v56, %v2235_v14 }
 0xfbf   :  { %2896 = vmatmul.mubr.msk.f32.vlgmr.msra.gmra.mrb[26].mxu0 %vm79_vm15, %v63_v59 }
 0xfc0   :  { %3022 = vmatpush3.bf16.msra.mxu0 %v3019_v35  ;;  %2902 = vmatprep.mubr.msk.f32.mxu0 %vm79_vm15, %v2278_v55 }
 0xfc7   :  { %2903 = vmatmul.mubr.msk.f32.vlgmr.msra.gmra.mrb[26].mxu0 %vm79_vm15, %v2280_v37 }
0x109a   :  { %v2904_v36 = vpop.f32.mrb[26].mxu0 }
0x109b   :  { %v2538_v27 = vmul.f32 0.5, %v2904_v36  ;;  %v2528_v21 = vpop.f32.mrb[27].mxu0 }
0x109c   :  { %v2537_v20 = vmul.f32 0.5, %v2528_v21 }
0x109d   :  { %2540 = vst.msk [vmem:[#allocation5 + $0x8] sm:$0xff] %vm79_vm15, %v2538_v27 }
0x109e   :  { %2539 = vst.msk [vmem:[#allocation5] sm:$0xff] %vm79_vm15, %v2537_v20 }
0x109f   :  { %3199 = shalt.err (!%p3196_p3)
}
0x10a0   :  { %s3200_s27 = scalar_lea.hbm %s3955_s5, 256 }
0x10a1   :  { %p3201_p4 = scmp.ne.s32.totalorder %s3955_s5, %s3200_s27  ;;  %p3204_p5 = scmp.lt.u32.totalorder %s3200_s27, %s3955_s5 }
0x10a3   :  { %p3206_p6 = pnand %p3204_p5, %p3201_p4 }
0x10a5   :  { %3209 = shalt.err (!%p3206_p6)
}
0x10a6   :  { %s3219_s7 = smov 128   ;;  %s3220_s8 = smov 8  }
0x10a7   :  { %2552 = dma.vmem_to_hbm [thread:$0]  %s2547_s24, 256, %s3955_s5, [#allocation3], %s3219_s7, %s3219_s7, %s3220_s8  }
0x10a8   :  { %3212 = dma.done.wait [#allocation3], 256  }
0x10a9   :  { %3213 = vsyncadd [#allocation3], 4294967040 }
0x10aa   :  { %2556 = vsyncpa [#allocation3], 1 }
0x10ab   :  { %2557 = vsyncpa [#allocation4], 1 }

</bundles_post_ra>
